<compile_context>
chip_gen: v7x
topology: tpu7x:2x2x1
jax: 0.10.0
libtpu: 0.0.40
codegen_flags: <defaults>
</compile_context>

<pallas_src>
import functools

import jax
import jax.numpy as jnp
from jax.experimental import pallas as pl
from jax.experimental.pallas import tpu as pltpu


def _round_up(x, m):
    return ((x + m - 1) // m) * m


# ----------------------------- Pallas kernel ------------------------------ #
def _gru_encoder_kernel(x_ref,       # (tc, Bt, D)   time-major chunk (mxu dtype)
                        wih_ref,     # (D, 3Hp)      fused input->gate weights (r|z|n)
                        whh_ref,     # (Hp, 3Hp)     fused hidden->gate weights (r|z|n)
                        bx_ref,      # (1, 3Hp)      [b_ir+b_hr | b_iz+b_hz | b_in]
                        bhn_ref,     # (1, Hp)       b_hn (inside the r * (.) term)
                        whead_ref,   # (Hp, Op)      [hidden2mu | hidden2var | 0]
                        bhead_ref,   # (1, Op)
                        out_ref,     # (Bt, Op)      [z_mu | z_var | 0], f32
                        h_scratch,   # VMEM (Bt, Hp) carried hidden state, f32
                        gx_scratch,  # VMEM (tc*Bt, 3Hp) hoisted input gates
                        *, tc, rem, bt, hp, unroll):
    chunk = pl.program_id(1)
    n_chunks = pl.num_programs(1)
    d = x_ref.shape[-1]

    @pl.when(chunk == 0)
    def _init():
        h_scratch[...] = jnp.zeros_like(h_scratch)

    # Hoisted input projection: one lane-dense (tc*Bt, D) @ (D, 3Hp) MXU pass
    # per time chunk.  bt % 8 == 0, so the reshape is a free re-view.
    x2 = x_ref[...].reshape(tc * bt, d)
    gx = jnp.dot(x2, wih_ref[...], preferred_element_type=jnp.float32)
    gx_scratch[...] = (gx + bx_ref[...]).astype(gx_scratch.dtype)

    whh = whh_ref[...]
    bhn = bhn_ref[...].astype(jnp.float32)
    mxu_dtype = whh.dtype

    def step(t, h):
        # Only the hidden-side matmul sits on the serial critical path.
        gh = jnp.dot(h.astype(mxu_dtype), whh,
                     preferred_element_type=jnp.float32)            # (Bt, 3Hp)
        row = pl.multiple_of(t * bt, 8)                              # aligned
        gxt = gx_scratch[pl.ds(row, bt), :]                          # (Bt, 3Hp)
        # Fused r/z activation over the first 2*Hp (lane-aligned) columns.
        rz = jax.nn.sigmoid(gxt[:, :2 * hp] + gh[:, :2 * hp])
        r = rz[:, :hp]
        z = rz[:, hp:]
        n = jnp.tanh(gxt[:, 2 * hp:] + r * (gh[:, 2 * hp:] + bhn))
        return (1.0 - z) * n + z * h                                 # f32 carry

    def run_steps(n_steps):
        return jax.lax.fori_loop(0, n_steps, step, h_scratch[...],
                                 unroll=min(unroll, n_steps))

    def write_heads(h):
        out_ref[...] = (
            jnp.dot(h.astype(mxu_dtype), whead_ref[...],
                    preferred_element_type=jnp.float32) + bhead_ref[...])

    if rem == tc:
        # Every chunk has the same static trip count.
        h = run_steps(tc)
        h_scratch[...] = h

        @pl.when(chunk == n_chunks - 1)
        def _heads():
            write_heads(h)
    else:
        # Tail chunk runs a statically shorter loop: no per-step masking and
        # no reads of the zero-padded timesteps.
        @pl.when(chunk < n_chunks - 1)
        def _full():
            h_scratch[...] = run_steps(tc)

        @pl.when(chunk == n_chunks - 1)
        def _tail():
            h = run_steps(rem)
            h_scratch[...] = h
            write_heads(h)


# ------------------------------ JAX wrapper -------------------------------- #
def gru_encoder_forward(input_sequences, params, *,
                        mxu_dtype=jnp.bfloat16, time_chunk=None,
                        batch_tile=None, unroll=8):
    """Returns (z_mu, z_var, input_embedding), matching GRUEncoder.forward.

    mxu_dtype: dtype of the MXU operands (x / weights / h-as-operand).  bf16
      is the default on all generations (v5e's MXU takes bf16 natively; only
      the VPU/EUP gate math must stay f32, which it does).  Pass jnp.float32
      for bit-tighter results.  Note the recurrent bf16 operand rounding
      compounds with T; validate tolerance for long sequences.
    batch_tile: padded-batch rows per grid step (multiple of 8).  Leave None
      on v5e/v6e (1 TensorCore); on v7x set it to half the padded batch so the
      leading "parallel" grid axis shards the recurrence across both cores.
    """
    emb_table = params["embedding"]                                   # (V, D)
    input_embedding = jnp.take(emb_table, input_sequences, axis=0)    # (B,T,D)

    B, T, D = input_embedding.shape
    H = params["hidden_dim"]
    Z = params["z_dim"]
    Hp = params["whh_cat"].shape[0]       # H padded to a lane multiple (128)
    Op = params["whead"].shape[1]         # 2*Z padded to a lane multiple (128)

    # --- batch padding / tiling (sublane-aligned per-step gx slices) -------
    Bp = _round_up(B, 8)
    if batch_tile is None:
        Bt = Bp
    else:
        Bt = int(batch_tile)
        assert Bp % Bt == 0 and Bt % 8 == 0, "batch_tile must divide padded B and be a multiple of 8"
    n_btiles = Bp // Bt

    # --- VMEM-aware time-chunk selection + explicit scoped-VMEM limit ------
    try:
        info = pltpu.get_tpu_info()
        vmem_cap = int(getattr(info, "vmem_capacity_bytes", 0)) or (64 << 20)
    except Exception:
        vmem_cap = 64 << 20               # conservative (v7x per-core VMEM)

    x_item = jnp.dtype(mxu_dtype).itemsize
    gx_item = x_item                      # gx scratch stored in mxu_dtype
    fixed_bytes = (2 * (D * 3 * Hp + Hp * 3 * Hp + Hp * Op) * x_item   # weights (dbl-buffered)
                   + 2 * (3 * Hp + Hp + Op) * 4                        # biases
                   + Bt * Hp * 4 + 2 * Bt * Op * 4)                    # h scratch + out
    per_tc_bytes = 2 * Bt * D * x_item + Bt * 3 * Hp * gx_item         # x (dbl) + gx scratch
    budget = vmem_cap // 2                # leave headroom for compiler scratch
    tc_fit = max(8, (budget - fixed_bytes) // max(per_tc_bytes, 1))
    if time_chunk is None:
        tc = int(min(T, tc_fit, 256))
    else:
        tc = int(min(T, time_chunk))
    tc = max(tc, 1)
    n_chunks = int(pl.cdiv(T, tc))
    rem = T - (n_chunks - 1) * tc

    need_bytes = fixed_bytes + per_tc_bytes * tc
    vmem_limit = int(min(max(2 * need_bytes, 32 << 20), int(vmem_cap * 0.9)))

    # --- time-major layout, zero-padded to (n_chunks*tc, Bp, D) ------------
    x_tm = jnp.transpose(input_embedding, (1, 0, 2))                  # (T,B,D)
    pad_t = n_chunks * tc - T
    pad_b = Bp - B
    if pad_t or pad_b:
        x_tm = jnp.pad(x_tm, ((0, pad_t), (0, pad_b), (0, 0)))
    x_tm = x_tm.astype(mxu_dtype)

    wih = params["wih_cat"].astype(mxu_dtype)     # (D, 3Hp)
    whh = params["whh_cat"].astype(mxu_dtype)     # (Hp, 3Hp)
    whead = params["whead"].astype(mxu_dtype)     # (Hp, Op)
    bx, bhn, bhead = params["bx"], params["bhn"], params["bhead"]   # f32

    def const_spec(shape):
        # Constant index_map -> block stays resident, no per-chunk re-DMA.
        return pl.BlockSpec(shape, lambda bi, c: (0, 0))

    kernel = functools.partial(_gru_encoder_kernel, tc=tc, rem=rem,
                               bt=Bt, hp=Hp, unroll=unroll)

    out = pl.pallas_call(
        kernel,
        grid=(n_btiles, n_chunks),
        in_specs=[
            pl.BlockSpec((tc, Bt, D), lambda bi, c: (c, bi, 0)),   # x chunk
            const_spec((D, 3 * Hp)),
            const_spec((Hp, 3 * Hp)),
            const_spec((1, 3 * Hp)),
            const_spec((1, Hp)),
            const_spec((Hp, Op)),
            const_spec((1, Op)),
        ],
        out_specs=pl.BlockSpec((Bt, Op), lambda bi, c: (bi, 0)),
        out_shape=jax.ShapeDtypeStruct((Bp, Op), jnp.float32),
        scratch_shapes=[
            pltpu.VMEM((Bt, Hp), jnp.float32),           # carried hidden state
            pltpu.VMEM((tc * Bt, 3 * Hp), mxu_dtype),    # hoisted input gates
        ],
        compiler_params=pltpu.CompilerParams(
            dimension_semantics=("parallel", "arbitrary"),  # batch || , time serial
            vmem_limit_bytes=vmem_limit),
    )(x_tm, wih, whh, bx, bhn, whead, bhead)

    z_mu = out[:B, :Z]
    z_var = out[:B, Z:2 * Z]
    return z_mu, z_var, input_embedding


# ------------------------- deterministic init ------------------------------ #
def xavier_uniform(key, shape):
    fan_out, fan_in = shape
    bound = (6.0 / (fan_in + fan_out)) ** 0.5
    return jax.random.uniform(key, shape, jnp.float32, -bound, bound)


def make_torch_params(key, num_embeddings, input_dim, hidden_dim, z_dim):
    """Parameters in PyTorch layout (weight_ih_l0 (3H,D), gate order r,z,n)."""
    D, H, Z = input_dim, hidden_dim, z_dim
    ks = jax.random.split(key, 9)
    bnd = 1.0 / H
    return {
        "embedding": xavier_uniform(ks[0], (num_embeddings, D)),
        "w_ih": xavier_uniform(ks[1], (3 * H, D)),
        "w_hh": xavier_uniform(ks[2], (3 * H, H)),
        "b_ih": jax.random.uniform(ks[3], (3 * H,), jnp.float32, -bnd, bnd),
        "b_hh": jax.random.uniform(ks[4], (3 * H,), jnp.float32, -bnd, bnd),
        "w_mu": xavier_uniform(ks[5], (Z, H)),
        "b_mu": jax.random.uniform(ks[6], (Z,), jnp.float32, -bnd, bnd),
        "w_var": xavier_uniform(ks[7], (Z, H)),
        "b_var": jax.random.uniform(ks[8], (Z,), jnp.float32, -bnd, bnd),
    }


def pack_params(p, lane=128):
    """Repack PyTorch-layout params into the fused, lane-aligned kernel layout.

    H is padded to Hp (multiple of 128) per gate block and the head output to
    Op = roundup(2Z, 128); all padding is zeros, which is exact for the GRU
    recurrence (padded hidden lanes stay identically zero).
    """
    H = p["w_hh"].shape[1]
    D = p["w_ih"].shape[1]
    Z = p["w_mu"].shape[0]
    Hp = _round_up(H, lane)
    Op = _round_up(2 * Z, lane)
    b_ih, b_hh = p["b_ih"], p["b_hh"]

    wih_cat = jnp.zeros((D, 3 * Hp), jnp.float32)
    whh_cat = jnp.zeros((Hp, 3 * Hp), jnp.float32)
    bx = jnp.zeros((1, 3 * Hp), jnp.float32)
    # Fold b_ir+b_hr, b_iz+b_hz and b_in into the hoisted projection; b_hn
    # stays separate (it sits inside r * (h @ W_hn + b_hn)).
    gate_bias = [b_ih[0:H] + b_hh[0:H],
                 b_ih[H:2 * H] + b_hh[H:2 * H],
                 b_ih[2 * H:3 * H]]
    for g in range(3):
        wih_cat = wih_cat.at[:, g * Hp:g * Hp + H].set(p["w_ih"][g * H:(g + 1) * H, :].T)
        whh_cat = whh_cat.at[:H, g * Hp:g * Hp + H].set(p["w_hh"][g * H:(g + 1) * H, :].T)
        bx = bx.at[0, g * Hp:g * Hp + H].set(gate_bias[g])

    bhn = jnp.zeros((1, Hp), jnp.float32).at[0, :H].set(b_hh[2 * H:3 * H])

    whead = jnp.zeros((Hp, Op), jnp.float32)
    whead = whead.at[:H, :Z].set(p["w_mu"].T).at[:H, Z:2 * Z].set(p["w_var"].T)
    bhead = jnp.zeros((1, Op), jnp.float32)
    bhead = bhead.at[0, :Z].set(p["b_mu"]).at[0, Z:2 * Z].set(p["b_var"])

    return {
        "embedding": p["embedding"],
        "wih_cat": wih_cat, "whh_cat": whh_cat,
        "bx": bx, "bhn": bhn,
        "whead": whead, "bhead": bhead,
        "hidden_dim": H, "z_dim": Z,
    }


# --------------------------- pure-JAX reference ----------------------------- #
def reference_forward(input_sequences, p):
    emb = jnp.take(p["embedding"], input_sequences, axis=0)  # (B, T, D)
    B, T, D = emb.shape
    H = p["w_hh"].shape[1]
    w_ih, w_hh, b_ih, b_hh = p["w_ih"], p["w_hh"], p["b_ih"], p["b_hh"]
    h = jnp.zeros((B, H), jnp.float32)
    for t in range(T):
        x_t = emb[:, t, :]
        gi = x_t @ w_ih.T + b_ih
        gh = h @ w_hh.T + b_hh
        r = jax.nn.sigmoid(gi[:, 0:H] + gh[:, 0:H])
        z = jax.nn.sigmoid(gi[:, H:2 * H] + gh[:, H:2 * H])
        n = jnp.tanh(gi[:, 2 * H:] + r * gh[:, 2 * H:])
        h = (1.0 - z) * n + z * h
    z_mu = h @ p["w_mu"].T + p["b_mu"]
    z_var = h @ p["w_var"].T + p["b_var"]
    return z_mu, z_var, emb


# ---------------------------------- main ------------------------------------ #
if __name__ == "__main__":
    batch, seq = 2, 8
    input_dim, hidden_dim, z_dim = 16, 32, 8
    num_embeddings = 20

    key = jax.random.PRNGKey(0)
    k_param, k_data = jax.random.split(key)
    torch_params = make_torch_params(k_param, num_embeddings, input_dim,
                                     hidden_dim, z_dim)
    params = pack_params(torch_params)
    input_sequences = jax.random.randint(
        k_data, (batch, seq), 0, num_embeddings, dtype=jnp.int32)

    r_mu, r_var, r_emb = reference_forward(input_sequences, torch_params)

    # f32 MXU operands, single time chunk: tight check vs. the reference.
    z_mu, z_var, input_embedding = gru_encoder_forward(
        input_sequences, params, mxu_dtype=jnp.float32)
    jax.block_until_ready((z_mu, z_var, input_embedding))
    assert z_mu.shape == (batch, z_dim) and z_var.shape == (batch, z_dim)
    assert input_embedding.shape == (batch, seq, input_dim)
    assert jnp.allclose(z_mu, r_mu, rtol=1e-2, atol=1e-2)
    assert jnp.allclose(z_var, r_var, rtol=1e-2, atol=1e-2)
    assert jnp.allclose(input_embedding, r_emb)

    # f32, multi-chunk grid with a ragged tail (T=8, tc=3 -> chunks 3,3,2):
    # exercises the chunked recurrence + static short tail loop.
    z_mu_c, z_var_c, _ = gru_encoder_forward(
        input_sequences, params, mxu_dtype=jnp.float32, time_chunk=3)
    jax.block_until_ready((z_mu_c, z_var_c))
    assert jnp.allclose(z_mu_c, r_mu, rtol=1e-2, atol=1e-2)
    assert jnp.allclose(z_var_c, r_var, rtol=1e-2, atol=1e-2)

    # bf16 MXU-operand path (default; f32 accumulation and gate math).
    z_mu_bf, z_var_bf, _ = gru_encoder_forward(input_sequences, params)
    jax.block_until_ready((z_mu_bf, z_var_bf))
    assert jnp.allclose(z_mu_bf, r_mu, rtol=5e-2, atol=5e-2)
    assert jnp.allclose(z_var_bf, r_var, rtol=5e-2, atol=5e-2)

    print("KERNEL_OK")
</pallas_src>

<mosaic_0001>
module attributes {stable_mosaic.version = 11 : i64} {
  func.func @_gru_encoder_kernel(%arg0: i32, %arg1: i32, %arg2: memref<8x8x16xf32, #tpu.memory_space<vmem>>, %arg3: memref<16x384xf32, #tpu.memory_space<vmem>>, %arg4: memref<128x384xf32, #tpu.memory_space<vmem>>, %arg5: memref<1x384xf32, #tpu.memory_space<vmem>>, %arg6: memref<1x128xf32, #tpu.memory_space<vmem>>, %arg7: memref<128x128xf32, #tpu.memory_space<vmem>>, %arg8: memref<1x128xf32, #tpu.memory_space<vmem>>, %arg9: memref<8x128xf32, #tpu.memory_space<vmem>>, %arg10: memref<8x128xf32, #tpu.memory_space<vmem>>, %arg11: memref<64x384xf32, #tpu.memory_space<vmem>>) attributes {dimension_semantics = [#tpu.dimension_semantics<parallel>, #tpu.dimension_semantics<arbitrary>], iteration_bounds = array<i64: 1, 1>, scalar_prefetch = 0 : i64, scratch_operands = 2 : i64, tpu.core_type = #tpu.core_type<tc>, window_params = [{transform_indices = @transform_0, window_bounds = array<i64: 8, 8, 16>}, {pipeline_mode = #tpu.pipeline_mode<synchronous>, transform_indices = @transform_1, window_bounds = array<i64: 16, 384>}, {pipeline_mode = #tpu.pipeline_mode<synchronous>, transform_indices = @transform_2, window_bounds = array<i64: 128, 384>}, {pipeline_mode = #tpu.pipeline_mode<synchronous>, transform_indices = @transform_3, window_bounds = array<i64: 1, 384>}, {pipeline_mode = #tpu.pipeline_mode<synchronous>, transform_indices = @transform_4, window_bounds = array<i64: 1, 128>}, {pipeline_mode = #tpu.pipeline_mode<synchronous>, transform_indices = @transform_5, window_bounds = array<i64: 128, 128>}, {pipeline_mode = #tpu.pipeline_mode<synchronous>, transform_indices = @transform_6, window_bounds = array<i64: 1, 128>}, {transform_indices = @transform_7, window_bounds = array<i64: 8, 128>}]} {
    %c0_i32 = arith.constant 0 : i32
    %0 = arith.cmpi eq, %arg1, %c0_i32 : i32
    %1 = arith.extui %0 : i1 to i32
    %c0_i32_0 = arith.constant 0 : i32
    %2 = arith.cmpi ne, %1, %c0_i32_0 : i32
    scf.if %2 {
      %cst_60 = arith.constant 0.000000e+00 : f32
      %234 = vector.broadcast %cst_60 : f32 to vector<8x128xf32>
      %c0_61 = arith.constant 0 : index
      %c0_62 = arith.constant 0 : index
      %235 = vector.load %arg10[%c0_61, %c0_62] : memref<8x128xf32, #tpu.memory_space<vmem>>, vector<8x128xf32>
      tpu.vector_store %arg10[%c0_61, %c0_62], %234 {strides = array<i32>} : memref<8x128xf32, #tpu.memory_space<vmem>>, vector<8x128xf32>,
    } else {
    }
    %c0 = arith.constant 0 : index
    %c0_1 = arith.constant 0 : index
    %c0_2 = arith.constant 0 : index
    %3 = vector.load %arg2[%c0, %c0_1, %c0_2] : memref<8x8x16xf32, #tpu.memory_space<vmem>>, vector<8x8x16xf32>
    %4 = vector.shape_cast %3 : vector<8x8x16xf32> to vector<64x16xf32>
    %c0_3 = arith.constant 0 : index
    %c0_4 = arith.constant 0 : index
    %5 = vector.load %arg3[%c0_3, %c0_4] : memref<16x384xf32, #tpu.memory_space<vmem>>, vector<16x384xf32>
    %cst = arith.constant dense<0.000000e+00> : vector<64x384xf32>
    %6 = tpu.matmul %4, %5, %cst {dimension_numbers = #tpu.dot_dimension_numbers<[1], [0], [0], [1], [0, 0, 1, 1], [], []>} : vector<64x16xf32>, vector<16x384xf32>, vector<64x384xf32> -> vector<64x384xf32>
    %c0_5 = arith.constant 0 : index
    %c0_6 = arith.constant 0 : index
    %7 = vector.load %arg5[%c0_5, %c0_6] : memref<1x384xf32, #tpu.memory_space<vmem>>, vector<1x384xf32>
    %8 = vector.broadcast %7 : vector<1x384xf32> to vector<64x384xf32>
    %9 = arith.addf %6, %8 : vector<64x384xf32>
    %c0_7 = arith.constant 0 : index
    %c0_8 = arith.constant 0 : index
    %10 = vector.load %arg11[%c0_7, %c0_8] : memref<64x384xf32, #tpu.memory_space<vmem>>, vector<64x384xf32>
    tpu.vector_store %arg11[%c0_7, %c0_8], %9 {strides = array<i32>} : memref<64x384xf32, #tpu.memory_space<vmem>>, vector<64x384xf32>,
    %c0_9 = arith.constant 0 : index
    %c0_10 = arith.constant 0 : index
    %11 = vector.load %arg4[%c0_9, %c0_10] : memref<128x384xf32, #tpu.memory_space<vmem>>, vector<128x384xf32>
    %c0_11 = arith.constant 0 : index
    %c0_12 = arith.constant 0 : index
    %12 = vector.load %arg6[%c0_11, %c0_12] : memref<1x128xf32, #tpu.memory_space<vmem>>, vector<1x128xf32>
    %c0_13 = arith.constant 0 : index
    %c0_14 = arith.constant 0 : index
    %13 = vector.load %arg10[%c0_13, %c0_14] : memref<8x128xf32, #tpu.memory_space<vmem>>, vector<8x128xf32>
    %c0_i32_15 = arith.constant 0 : i32
    %cst_16 = arith.constant dense<0.000000e+00> : vector<8x384xf32>
    %14 = tpu.matmul %13, %11, %cst_16 {dimension_numbers = #tpu.dot_dimension_numbers<[1], [0], [0], [1], [0, 0, 1, 1], [], []>} : vector<8x128xf32>, vector<128x384xf32>, vector<8x384xf32> -> vector<8x384xf32>
    %c8_i32 = arith.constant 8 : i32
    %15 = arith.muli %c0_i32_15, %c8_i32 : i32
    %16 = tpu.assume_multiple %15, 8 : i32
    %17 = arith.index_cast %16 : i32 to index
    %c0_17 = arith.constant 0 : index
    %18 = vector.load %arg11[%17, %c0_17] : memref<64x384xf32, #tpu.memory_space<vmem>>, vector<8x384xf32>
    %19 = vector.extract_strided_slice %18 {offsets = [0, 0], sizes = [8, 256], strides = [1, 1]} : vector<8x384xf32> to vector<8x256xf32>
    %20 = vector.extract_strided_slice %14 {offsets = [0, 0], sizes = [8, 256], strides = [1, 1]} : vector<8x384xf32> to vector<8x256xf32>
    %21 = arith.addf %19, %20 : vector<8x256xf32>
    %22 = arith.negf %21 : vector<8x256xf32>
    %23 = math.exp %22 : vector<8x256xf32>
    %cst_18 = arith.constant 1.000000e+00 : f32
    %24 = vector.broadcast %cst_18 : f32 to vector<8x256xf32>
    %25 = arith.addf %24, %23 : vector<8x256xf32>
    %26 = arith.divf %24, %25 : vector<8x256xf32>
    %27 = vector.extract_strided_slice %26 {offsets = [0, 0], sizes = [8, 128], strides = [1, 1]} : vector<8x256xf32> to vector<8x128xf32>
    %28 = vector.extract_strided_slice %26 {offsets = [0, 128], sizes = [8, 128], strides = [1, 1]} : vector<8x256xf32> to vector<8x128xf32>
    %29 = vector.extract_strided_slice %18 {offsets = [0, 256], sizes = [8, 128], strides = [1, 1]} : vector<8x384xf32> to vector<8x128xf32>
    %30 = vector.extract_strided_slice %14 {offsets = [0, 256], sizes = [8, 128], strides = [1, 1]} : vector<8x384xf32> to vector<8x128xf32>
    %31 = vector.broadcast %12 : vector<1x128xf32> to vector<8x128xf32>
    %32 = arith.addf %30, %31 : vector<8x128xf32>
    %33 = arith.mulf %27, %32 : vector<8x128xf32>
    %34 = arith.addf %29, %33 : vector<8x128xf32>
    %35 = math.tanh %34 : vector<8x128xf32>
    %cst_19 = arith.constant 1.000000e+00 : f32
    %36 = vector.broadcast %cst_19 : f32 to vector<8x128xf32>
    %37 = arith.subf %36, %28 : vector<8x128xf32>
    %38 = arith.mulf %37, %35 : vector<8x128xf32>
    %39 = arith.mulf %28, %13 : vector<8x128xf32>
    %40 = arith.addf %38, %39 : vector<8x128xf32>
    %c1_i32 = arith.constant 1 : i32
    %cst_20 = arith.constant dense<0.000000e+00> : vector<8x384xf32>
    %41 = tpu.matmul %40, %11, %cst_20 {dimension_numbers = #tpu.dot_dimension_numbers<[1], [0], [0], [1], [0, 0, 1, 1], [], []>} : vector<8x128xf32>, vector<128x384xf32>, vector<8x384xf32> -> vector<8x384xf32>
    %c8_i32_21 = arith.constant 8 : i32
    %42 = arith.muli %c1_i32, %c8_i32_21 : i32
    %43 = tpu.assume_multiple %42, 8 : i32
    %44 = arith.index_cast %43 : i32 to index
    %c0_22 = arith.constant 0 : index
    %45 = vector.load %arg11[%44, %c0_22] : memref<64x384xf32, #tpu.memory_space<vmem>>, vector<8x384xf32>
    %46 = vector.extract_strided_slice %45 {offsets = [0, 0], sizes = [8, 256], strides = [1, 1]} : vector<8x384xf32> to vector<8x256xf32>
    %47 = vector.extract_strided_slice %41 {offsets = [0, 0], sizes = [8, 256], strides = [1, 1]} : vector<8x384xf32> to vector<8x256xf32>
    %48 = arith.addf %46, %47 : vector<8x256xf32>
    %49 = arith.negf %48 : vector<8x256xf32>
    %50 = math.exp %49 : vector<8x256xf32>
    %cst_23 = arith.constant 1.000000e+00 : f32
    %51 = vector.broadcast %cst_23 : f32 to vector<8x256xf32>
    %52 = arith.addf %51, %50 : vector<8x256xf32>
    %53 = arith.divf %51, %52 : vector<8x256xf32>
    %54 = vector.extract_strided_slice %53 {offsets = [0, 0], sizes = [8, 128], strides = [1, 1]} : vector<8x256xf32> to vector<8x128xf32>
    %55 = vector.extract_strided_slice %53 {offsets = [0, 128], sizes = [8, 128], strides = [1, 1]} : vector<8x256xf32> to vector<8x128xf32>
    %56 = vector.extract_strided_slice %45 {offsets = [0, 256], sizes = [8, 128], strides = [1, 1]} : vector<8x384xf32> to vector<8x128xf32>
    %57 = vector.extract_strided_slice %41 {offsets = [0, 256], sizes = [8, 128], strides = [1, 1]} : vector<8x384xf32> to vector<8x128xf32>
    %58 = vector.broadcast %12 : vector<1x128xf32> to vector<8x128xf32>
    %59 = arith.addf %57, %58 : vector<8x128xf32>
    %60 = arith.mulf %54, %59 : vector<8x128xf32>
    %61 = arith.addf %56, %60 : vector<8x128xf32>
    %62 = math.tanh %61 : vector<8x128xf32>
    %cst_24 = arith.constant 1.000000e+00 : f32
    %63 = vector.broadcast %cst_24 : f32 to vector<8x128xf32>
    %64 = arith.subf %63, %55 : vector<8x128xf32>
    %65 = arith.mulf %64, %62 : vector<8x128xf32>
    %66 = arith.mulf %55, %40 : vector<8x128xf32>
    %67 = arith.addf %65, %66 : vector<8x128xf32>
    %c2_i32 = arith.constant 2 : i32
    %cst_25 = arith.constant dense<0.000000e+00> : vector<8x384xf32>
    %68 = tpu.matmul %67, %11, %cst_25 {dimension_numbers = #tpu.dot_dimension_numbers<[1], [0], [0], [1], [0, 0, 1, 1], [], []>} : vector<8x128xf32>, vector<128x384xf32>, vector<8x384xf32> -> vector<8x384xf32>
    %c8_i32_26 = arith.constant 8 : i32
    %69 = arith.muli %c2_i32, %c8_i32_26 : i32
    %70 = tpu.assume_multiple %69, 8 : i32
    %71 = arith.index_cast %70 : i32 to index
    %c0_27 = arith.constant 0 : index
    %72 = vector.load %arg11[%71, %c0_27] : memref<64x384xf32, #tpu.memory_space<vmem>>, vector<8x384xf32>
    %73 = vector.extract_strided_slice %72 {offsets = [0, 0], sizes = [8, 256], strides = [1, 1]} : vector<8x384xf32> to vector<8x256xf32>
    %74 = vector.extract_strided_slice %68 {offsets = [0, 0], sizes = [8, 256], strides = [1, 1]} : vector<8x384xf32> to vector<8x256xf32>
    %75 = arith.addf %73, %74 : vector<8x256xf32>
    %76 = arith.negf %75 : vector<8x256xf32>
    %77 = math.exp %76 : vector<8x256xf32>
    %cst_28 = arith.constant 1.000000e+00 : f32
    %78 = vector.broadcast %cst_28 : f32 to vector<8x256xf32>
    %79 = arith.addf %78, %77 : vector<8x256xf32>
    %80 = arith.divf %78, %79 : vector<8x256xf32>
    %81 = vector.extract_strided_slice %80 {offsets = [0, 0], sizes = [8, 128], strides = [1, 1]} : vector<8x256xf32> to vector<8x128xf32>
    %82 = vector.extract_strided_slice %80 {offsets = [0, 128], sizes = [8, 128], strides = [1, 1]} : vector<8x256xf32> to vector<8x128xf32>
    %83 = vector.extract_strided_slice %72 {offsets = [0, 256], sizes = [8, 128], strides = [1, 1]} : vector<8x384xf32> to vector<8x128xf32>
    %84 = vector.extract_strided_slice %68 {offsets = [0, 256], sizes = [8, 128], strides = [1, 1]} : vector<8x384xf32> to vector<8x128xf32>
    %85 = vector.broadcast %12 : vector<1x128xf32> to vector<8x128xf32>
    %86 = arith.addf %84, %85 : vector<8x128xf32>
    %87 = arith.mulf %81, %86 : vector<8x128xf32>
    %88 = arith.addf %83, %87 : vector<8x128xf32>
    %89 = math.tanh %88 : vector<8x128xf32>
    %cst_29 = arith.constant 1.000000e+00 : f32
    %90 = vector.broadcast %cst_29 : f32 to vector<8x128xf32>
    %91 = arith.subf %90, %82 : vector<8x128xf32>
    %92 = arith.mulf %91, %89 : vector<8x128xf32>
    %93 = arith.mulf %82, %67 : vector<8x128xf32>
    %94 = arith.addf %92, %93 : vector<8x128xf32>
    %c3_i32 = arith.constant 3 : i32
    %cst_30 = arith.constant dense<0.000000e+00> : vector<8x384xf32>
    %95 = tpu.matmul %94, %11, %cst_30 {dimension_numbers = #tpu.dot_dimension_numbers<[1], [0], [0], [1], [0, 0, 1, 1], [], []>} : vector<8x128xf32>, vector<128x384xf32>, vector<8x384xf32> -> vector<8x384xf32>
    %c8_i32_31 = arith.constant 8 : i32
    %96 = arith.muli %c3_i32, %c8_i32_31 : i32
    %97 = tpu.assume_multiple %96, 8 : i32
    %98 = arith.index_cast %97 : i32 to index
    %c0_32 = arith.constant 0 : index
    %99 = vector.load %arg11[%98, %c0_32] : memref<64x384xf32, #tpu.memory_space<vmem>>, vector<8x384xf32>
    %100 = vector.extract_strided_slice %99 {offsets = [0, 0], sizes = [8, 256], strides = [1, 1]} : vector<8x384xf32> to vector<8x256xf32>
    %101 = vector.extract_strided_slice %95 {offsets = [0, 0], sizes = [8, 256], strides = [1, 1]} : vector<8x384xf32> to vector<8x256xf32>
    %102 = arith.addf %100, %101 : vector<8x256xf32>
    %103 = arith.negf %102 : vector<8x256xf32>
    %104 = math.exp %103 : vector<8x256xf32>
    %cst_33 = arith.constant 1.000000e+00 : f32
    %105 = vector.broadcast %cst_33 : f32 to vector<8x256xf32>
    %106 = arith.addf %105, %104 : vector<8x256xf32>
    %107 = arith.divf %105, %106 : vector<8x256xf32>
    %108 = vector.extract_strided_slice %107 {offsets = [0, 0], sizes = [8, 128], strides = [1, 1]} : vector<8x256xf32> to vector<8x128xf32>
    %109 = vector.extract_strided_slice %107 {offsets = [0, 128], sizes = [8, 128], strides = [1, 1]} : vector<8x256xf32> to vector<8x128xf32>
    %110 = vector.extract_strided_slice %99 {offsets = [0, 256], sizes = [8, 128], strides = [1, 1]} : vector<8x384xf32> to vector<8x128xf32>
    %111 = vector.extract_strided_slice %95 {offsets = [0, 256], sizes = [8, 128], strides = [1, 1]} : vector<8x384xf32> to vector<8x128xf32>
    %112 = vector.broadcast %12 : vector<1x128xf32> to vector<8x128xf32>
    %113 = arith.addf %111, %112 : vector<8x128xf32>
    %114 = arith.mulf %108, %113 : vector<8x128xf32>
    %115 = arith.addf %110, %114 : vector<8x128xf32>
    %116 = math.tanh %115 : vector<8x128xf32>
    %cst_34 = arith.constant 1.000000e+00 : f32
    %117 = vector.broadcast %cst_34 : f32 to vector<8x128xf32>
    %118 = arith.subf %117, %109 : vector<8x128xf32>
    %119 = arith.mulf %118, %116 : vector<8x128xf32>
    %120 = arith.mulf %109, %94 : vector<8x128xf32>
    %121 = arith.addf %119, %120 : vector<8x128xf32>
    %c4_i32 = arith.constant 4 : i32
    %cst_35 = arith.constant dense<0.000000e+00> : vector<8x384xf32>
    %122 = tpu.matmul %121, %11, %cst_35 {dimension_numbers = #tpu.dot_dimension_numbers<[1], [0], [0], [1], [0, 0, 1, 1], [], []>} : vector<8x128xf32>, vector<128x384xf32>, vector<8x384xf32> -> vector<8x384xf32>
    %c8_i32_36 = arith.constant 8 : i32
    %123 = arith.muli %c4_i32, %c8_i32_36 : i32
    %124 = tpu.assume_multiple %123, 8 : i32
    %125 = arith.index_cast %124 : i32 to index
    %c0_37 = arith.constant 0 : index
    %126 = vector.load %arg11[%125, %c0_37] : memref<64x384xf32, #tpu.memory_space<vmem>>, vector<8x384xf32>
    %127 = vector.extract_strided_slice %126 {offsets = [0, 0], sizes = [8, 256], strides = [1, 1]} : vector<8x384xf32> to vector<8x256xf32>
    %128 = vector.extract_strided_slice %122 {offsets = [0, 0], sizes = [8, 256], strides = [1, 1]} : vector<8x384xf32> to vector<8x256xf32>
    %129 = arith.addf %127, %128 : vector<8x256xf32>
    %130 = arith.negf %129 : vector<8x256xf32>
    %131 = math.exp %130 : vector<8x256xf32>
    %cst_38 = arith.constant 1.000000e+00 : f32
    %132 = vector.broadcast %cst_38 : f32 to vector<8x256xf32>
    %133 = arith.addf %132, %131 : vector<8x256xf32>
    %134 = arith.divf %132, %133 : vector<8x256xf32>
    %135 = vector.extract_strided_slice %134 {offsets = [0, 0], sizes = [8, 128], strides = [1, 1]} : vector<8x256xf32> to vector<8x128xf32>
    %136 = vector.extract_strided_slice %134 {offsets = [0, 128], sizes = [8, 128], strides = [1, 1]} : vector<8x256xf32> to vector<8x128xf32>
    %137 = vector.extract_strided_slice %126 {offsets = [0, 256], sizes = [8, 128], strides = [1, 1]} : vector<8x384xf32> to vector<8x128xf32>
    %138 = vector.extract_strided_slice %122 {offsets = [0, 256], sizes = [8, 128], strides = [1, 1]} : vector<8x384xf32> to vector<8x128xf32>
    %139 = vector.broadcast %12 : vector<1x128xf32> to vector<8x128xf32>
    %140 = arith.addf %138, %139 : vector<8x128xf32>
    %141 = arith.mulf %135, %140 : vector<8x128xf32>
    %142 = arith.addf %137, %141 : vector<8x128xf32>
    %143 = math.tanh %142 : vector<8x128xf32>
    %cst_39 = arith.constant 1.000000e+00 : f32
    %144 = vector.broadcast %cst_39 : f32 to vector<8x128xf32>
    %145 = arith.subf %144, %136 : vector<8x128xf32>
    %146 = arith.mulf %145, %143 : vector<8x128xf32>
    %147 = arith.mulf %136, %121 : vector<8x128xf32>
    %148 = arith.addf %146, %147 : vector<8x128xf32>
    %c5_i32 = arith.constant 5 : i32
    %cst_40 = arith.constant dense<0.000000e+00> : vector<8x384xf32>
    %149 = tpu.matmul %148, %11, %cst_40 {dimension_numbers = #tpu.dot_dimension_numbers<[1], [0], [0], [1], [0, 0, 1, 1], [], []>} : vector<8x128xf32>, vector<128x384xf32>, vector<8x384xf32> -> vector<8x384xf32>
    %c8_i32_41 = arith.constant 8 : i32
    %150 = arith.muli %c5_i32, %c8_i32_41 : i32
    %151 = tpu.assume_multiple %150, 8 : i32
    %152 = arith.index_cast %151 : i32 to index
    %c0_42 = arith.constant 0 : index
    %153 = vector.load %arg11[%152, %c0_42] : memref<64x384xf32, #tpu.memory_space<vmem>>, vector<8x384xf32>
    %154 = vector.extract_strided_slice %153 {offsets = [0, 0], sizes = [8, 256], strides = [1, 1]} : vector<8x384xf32> to vector<8x256xf32>
    %155 = vector.extract_strided_slice %149 {offsets = [0, 0], sizes = [8, 256], strides = [1, 1]} : vector<8x384xf32> to vector<8x256xf32>
    %156 = arith.addf %154, %155 : vector<8x256xf32>
    %157 = arith.negf %156 : vector<8x256xf32>
    %158 = math.exp %157 : vector<8x256xf32>
    %cst_43 = arith.constant 1.000000e+00 : f32
    %159 = vector.broadcast %cst_43 : f32 to vector<8x256xf32>
    %160 = arith.addf %159, %158 : vector<8x256xf32>
    %161 = arith.divf %159, %160 : vector<8x256xf32>
    %162 = vector.extract_strided_slice %161 {offsets = [0, 0], sizes = [8, 128], strides = [1, 1]} : vector<8x256xf32> to vector<8x128xf32>
    %163 = vector.extract_strided_slice %161 {offsets = [0, 128], sizes = [8, 128], strides = [1, 1]} : vector<8x256xf32> to vector<8x128xf32>
    %164 = vector.extract_strided_slice %153 {offsets = [0, 256], sizes = [8, 128], strides = [1, 1]} : vector<8x384xf32> to vector<8x128xf32>
    %165 = vector.extract_strided_slice %149 {offsets = [0, 256], sizes = [8, 128], strides = [1, 1]} : vector<8x384xf32> to vector<8x128xf32>
    %166 = vector.broadcast %12 : vector<1x128xf32> to vector<8x128xf32>
    %167 = arith.addf %165, %166 : vector<8x128xf32>
    %168 = arith.mulf %162, %167 : vector<8x128xf32>
    %169 = arith.addf %164, %168 : vector<8x128xf32>
    %170 = math.tanh %169 : vector<8x128xf32>
    %cst_44 = arith.constant 1.000000e+00 : f32
    %171 = vector.broadcast %cst_44 : f32 to vector<8x128xf32>
    %172 = arith.subf %171, %163 : vector<8x128xf32>
    %173 = arith.mulf %172, %170 : vector<8x128xf32>
    %174 = arith.mulf %163, %148 : vector<8x128xf32>
    %175 = arith.addf %173, %174 : vector<8x128xf32>
    %c6_i32 = arith.constant 6 : i32
    %cst_45 = arith.constant dense<0.000000e+00> : vector<8x384xf32>
    %176 = tpu.matmul %175, %11, %cst_45 {dimension_numbers = #tpu.dot_dimension_numbers<[1], [0], [0], [1], [0, 0, 1, 1], [], []>} : vector<8x128xf32>, vector<128x384xf32>, vector<8x384xf32> -> vector<8x384xf32>
    %c8_i32_46 = arith.constant 8 : i32
    %177 = arith.muli %c6_i32, %c8_i32_46 : i32
    %178 = tpu.assume_multiple %177, 8 : i32
    %179 = arith.index_cast %178 : i32 to index
    %c0_47 = arith.constant 0 : index
    %180 = vector.load %arg11[%179, %c0_47] : memref<64x384xf32, #tpu.memory_space<vmem>>, vector<8x384xf32>
    %181 = vector.extract_strided_slice %180 {offsets = [0, 0], sizes = [8, 256], strides = [1, 1]} : vector<8x384xf32> to vector<8x256xf32>
    %182 = vector.extract_strided_slice %176 {offsets = [0, 0], sizes = [8, 256], strides = [1, 1]} : vector<8x384xf32> to vector<8x256xf32>
    %183 = arith.addf %181, %182 : vector<8x256xf32>
    %184 = arith.negf %183 : vector<8x256xf32>
    %185 = math.exp %184 : vector<8x256xf32>
    %cst_48 = arith.constant 1.000000e+00 : f32
    %186 = vector.broadcast %cst_48 : f32 to vector<8x256xf32>
    %187 = arith.addf %186, %185 : vector<8x256xf32>
    %188 = arith.divf %186, %187 : vector<8x256xf32>
    %189 = vector.extract_strided_slice %188 {offsets = [0, 0], sizes = [8, 128], strides = [1, 1]} : vector<8x256xf32> to vector<8x128xf32>
    %190 = vector.extract_strided_slice %188 {offsets = [0, 128], sizes = [8, 128], strides = [1, 1]} : vector<8x256xf32> to vector<8x128xf32>
    %191 = vector.extract_strided_slice %180 {offsets = [0, 256], sizes = [8, 128], strides = [1, 1]} : vector<8x384xf32> to vector<8x128xf32>
    %192 = vector.extract_strided_slice %176 {offsets = [0, 256], sizes = [8, 128], strides = [1, 1]} : vector<8x384xf32> to vector<8x128xf32>
    %193 = vector.broadcast %12 : vector<1x128xf32> to vector<8x128xf32>
    %194 = arith.addf %192, %193 : vector<8x128xf32>
    %195 = arith.mulf %189, %194 : vector<8x128xf32>
    %196 = arith.addf %191, %195 : vector<8x128xf32>
    %197 = math.tanh %196 : vector<8x128xf32>
    %cst_49 = arith.constant 1.000000e+00 : f32
    %198 = vector.broadcast %cst_49 : f32 to vector<8x128xf32>
    %199 = arith.subf %198, %190 : vector<8x128xf32>
    %200 = arith.mulf %199, %197 : vector<8x128xf32>
    %201 = arith.mulf %190, %175 : vector<8x128xf32>
    %202 = arith.addf %200, %201 : vector<8x128xf32>
    %c7_i32 = arith.constant 7 : i32
    %cst_50 = arith.constant dense<0.000000e+00> : vector<8x384xf32>
    %203 = tpu.matmul %202, %11, %cst_50 {dimension_numbers = #tpu.dot_dimension_numbers<[1], [0], [0], [1], [0, 0, 1, 1], [], []>} : vector<8x128xf32>, vector<128x384xf32>, vector<8x384xf32> -> vector<8x384xf32>
    %c8_i32_51 = arith.constant 8 : i32
    %204 = arith.muli %c7_i32, %c8_i32_51 : i32
    %205 = tpu.assume_multiple %204, 8 : i32
    %206 = arith.index_cast %205 : i32 to index
    %c0_52 = arith.constant 0 : index
    %207 = vector.load %arg11[%206, %c0_52] : memref<64x384xf32, #tpu.memory_space<vmem>>, vector<8x384xf32>
    %208 = vector.extract_strided_slice %207 {offsets = [0, 0], sizes = [8, 256], strides = [1, 1]} : vector<8x384xf32> to vector<8x256xf32>
    %209 = vector.extract_strided_slice %203 {offsets = [0, 0], sizes = [8, 256], strides = [1, 1]} : vector<8x384xf32> to vector<8x256xf32>
    %210 = arith.addf %208, %209 : vector<8x256xf32>
    %211 = arith.negf %210 : vector<8x256xf32>
    %212 = math.exp %211 : vector<8x256xf32>
    %cst_53 = arith.constant 1.000000e+00 : f32
    %213 = vector.broadcast %cst_53 : f32 to vector<8x256xf32>
    %214 = arith.addf %213, %212 : vector<8x256xf32>
    %215 = arith.divf %213, %214 : vector<8x256xf32>
    %216 = vector.extract_strided_slice %215 {offsets = [0, 0], sizes = [8, 128], strides = [1, 1]} : vector<8x256xf32> to vector<8x128xf32>
    %217 = vector.extract_strided_slice %215 {offsets = [0, 128], sizes = [8, 128], strides = [1, 1]} : vector<8x256xf32> to vector<8x128xf32>
    %218 = vector.extract_strided_slice %207 {offsets = [0, 256], sizes = [8, 128], strides = [1, 1]} : vector<8x384xf32> to vector<8x128xf32>
    %219 = vector.extract_strided_slice %203 {offsets = [0, 256], sizes = [8, 128], strides = [1, 1]} : vector<8x384xf32> to vector<8x128xf32>
    %220 = vector.broadcast %12 : vector<1x128xf32> to vector<8x128xf32>
    %221 = arith.addf %219, %220 : vector<8x128xf32>
    %222 = arith.mulf %216, %221 : vector<8x128xf32>
    %223 = arith.addf %218, %222 : vector<8x128xf32>
    %224 = math.tanh %223 : vector<8x128xf32>
    %cst_54 = arith.constant 1.000000e+00 : f32
    %225 = vector.broadcast %cst_54 : f32 to vector<8x128xf32>
    %226 = arith.subf %225, %217 : vector<8x128xf32>
    %227 = arith.mulf %226, %224 : vector<8x128xf32>
    %228 = arith.mulf %217, %202 : vector<8x128xf32>
    %229 = arith.addf %227, %228 : vector<8x128xf32>
    %c8_i32_55 = arith.constant 8 : i32
    %c0_56 = arith.constant 0 : index
    %c0_57 = arith.constant 0 : index
    %230 = vector.load %arg10[%c0_56, %c0_57] : memref<8x128xf32, #tpu.memory_space<vmem>>, vector<8x128xf32>
    tpu.vector_store %arg10[%c0_56, %c0_57], %229 {strides = array<i32>} : memref<8x128xf32, #tpu.memory_space<vmem>>, vector<8x128xf32>,
    %c0_i32_58 = arith.constant 0 : i32
    %231 = arith.cmpi eq, %arg1, %c0_i32_58 : i32
    %232 = arith.extui %231 : i1 to i32
    %c0_i32_59 = arith.constant 0 : i32
    %233 = arith.cmpi ne, %232, %c0_i32_59 : i32
    scf.if %233 {
      %c0_60 = arith.constant 0 : index
      %c0_61 = arith.constant 0 : index
      %234 = vector.load %arg7[%c0_60, %c0_61] : memref<128x128xf32, #tpu.memory_space<vmem>>, vector<128x128xf32>
      %cst_62 = arith.constant dense<0.000000e+00> : vector<8x128xf32>
      %235 = tpu.matmul %229, %234, %cst_62 {dimension_numbers = #tpu.dot_dimension_numbers<[1], [0], [0], [1], [0, 0, 1, 1], [], []>} : vector<8x128xf32>, vector<128x128xf32>, vector<8x128xf32> -> vector<8x128xf32>
      %c0_63 = arith.constant 0 : index
      %c0_64 = arith.constant 0 : index
      %236 = vector.load %arg8[%c0_63, %c0_64] : memref<1x128xf32, #tpu.memory_space<vmem>>, vector<1x128xf32>
      %237 = vector.broadcast %236 : vector<1x128xf32> to vector<8x128xf32>
      %238 = arith.addf %235, %237 : vector<8x128xf32>
      %c0_65 = arith.constant 0 : index
      %c0_66 = arith.constant 0 : index
      %239 = vector.load %arg9[%c0_65, %c0_66] : memref<8x128xf32, #tpu.memory_space<vmem>>, vector<8x128xf32>
      tpu.vector_store %arg9[%c0_65, %c0_66], %238 {strides = array<i32>} : memref<8x128xf32, #tpu.memory_space<vmem>>, vector<8x128xf32>,
    } else {
    }
    return
  }
  func.func @transform_0(%arg0: i32, %arg1: i32) -> (i32, i32, i32) {
    %c0_i32 = arith.constant 0 : i32
    %c0_i32_0 = arith.constant 0 : i32
    return %arg1, %arg0, %c0_i32 : i32, i32, i32
  }
  func.func @transform_1(%arg0: i32, %arg1: i32) -> (i32, i32) {
    %c0_i32 = arith.constant 0 : i32
    %c0_i32_0 = arith.constant 0 : i32
    %c0_i32_1 = arith.constant 0 : i32
    return %c0_i32, %c0_i32_0 : i32, i32
  }
  func.func @transform_2(%arg0: i32, %arg1: i32) -> (i32, i32) {
    %c0_i32 = arith.constant 0 : i32
    %c0_i32_0 = arith.constant 0 : i32
    %c0_i32_1 = arith.constant 0 : i32
    return %c0_i32, %c0_i32_0 : i32, i32
  }
  func.func @transform_3(%arg0: i32, %arg1: i32) -> (i32, i32) {
    %c0_i32 = arith.constant 0 : i32
    %c0_i32_0 = arith.constant 0 : i32
    %c0_i32_1 = arith.constant 0 : i32
    return %c0_i32, %c0_i32_0 : i32, i32
  }
  func.func @transform_4(%arg0: i32, %arg1: i32) -> (i32, i32) {
    %c0_i32 = arith.constant 0 : i32
    %c0_i32_0 = arith.constant 0 : i32
    %c0_i32_1 = arith.constant 0 : i32
    return %c0_i32, %c0_i32_0 : i32, i32
  }
  func.func @transform_5(%arg0: i32, %arg1: i32) -> (i32, i32) {
    %c0_i32 = arith.constant 0 : i32
    %c0_i32_0 = arith.constant 0 : i32
    %c0_i32_1 = arith.constant 0 : i32
    return %c0_i32, %c0_i32_0 : i32, i32
  }
  func.func @transform_6(%arg0: i32, %arg1: i32) -> (i32, i32) {
    %c0_i32 = arith.constant 0 : i32
    %c0_i32_0 = arith.constant 0 : i32
    %c0_i32_1 = arith.constant 0 : i32
    return %c0_i32, %c0_i32_0 : i32, i32
  }
  func.func @transform_7(%arg0: i32, %arg1: i32) -> (i32, i32) {
    %c0_i32 = arith.constant 0 : i32
    %c0_i32_0 = arith.constant 0 : i32
    return %arg0, %c0_i32 : i32, i32
  }
}

</mosaic_0001>

<bundles_post_ra>
// kernel: tpu_custom_call.1
= control target key start
LH: loop header
LB: loop body
LE: loop exit
PB: predicated region body
PF: predicated region fallthrough
CT: control target
= control target key end

     0   :  { %12 = vsyncpa [#allocation5], 0  ;;  %s3725_s0 = inlined_call_operand.hbm [shape: f32[8,8,16], index: 0, kind: input, shape index: {}]   ;;  %s3726_s1 = inlined_call_operand.hbm [shape: f32[16,384], index: 1, kind: input, shape index: {}]   ;;  %s3727_s2 = inlined_call_operand.hbm [shape: f32[128,384], index: 2, kind: input, shape index: {}]   ;;  %s3728_s3 = inlined_call_operand.vmem [shape: f32[1,384], index: 3, kind: input, shape index: {}]   ;;  %s3729_s4 = inlined_call_operand.vmem [shape: f32[1,128], index: 4, kind: input, shape index: {}]   ;;  %s3730_s5 = inlined_call_operand.hbm [shape: f32[128,128], index: 5, kind: input, shape index: {}]   ;;  %s3731_s6 = inlined_call_operand.vmem [shape: f32[1,128], index: 6, kind: input, shape index: {}]   ;;  %s3732_s7 = inlined_call_operand.hbm [shape: f32[8,128], index: 7, kind: output, shape index: {}]  }
   0x1   :  { %13 = vsyncpa [#allocation8], 0 }
   0x2   :  { %14 = vsyncpa [#allocation11], 0 }
   0x3   :  { %15 = vsyncpa [#allocation6], 0  ;;  %s3165_s24 = smov [#allocation7]   ;;  %s3047_s28 = scalar_lea.hbm %s3726_s1, 768 }
   0x4   :  { %s33_s25 = sshll.u32 %s3165_s24, 4  ;;  %p3048_p0 = scmp.ne.s32.totalorder %s3726_s1, %s3047_s28  ;;  %s34_s25 = int_to_ptr.vmem [resolvable:$true] %s33_s25 }
   0x5   :  { %p3051_p1 = scmp.lt.u32.totalorder %s3047_s28, %s3726_s1 }
   0x7   :  { %p3053_p2 = pnand %p3051_p1, %p3048_p0 }
   0x9   :  { %3056 = shalt.err (!%p3053_p2)
}
   0xa   :  { %s3057_s10 = scalar_lea.vmem %s34_s25, 768  ;;  %p3062_p4 = scmp.lt.s32.totalorder %s34_s25, %s34_s25 }
   0xb   :  { %p3058_p3 = scmp.ne.s32.totalorder %s34_s25, %s3057_s10  ;;  %p3063_p5 = scmp.lt.s32.totalorder %s3057_s10, %s3057_s10 }
   0xd   :  { %p3064_p6 = por %p3063_p5, %p3062_p4 }
   0xf   :  { %p3065_p7 = pnand %p3064_p6, %p3058_p3 }
  0x11   :  { %3068 = shalt.err (!%p3065_p7)
}
  0x12   :  { %s3166_s11 = smov 384   ;;  %s3167_s12 = smov 24  }
  0x13   :  { %39 = dma.hbm_to_vmem [thread:$0]  %s3726_s1, 768, %s34_s25, [#allocation8], %s3166_s11, %s3166_s11, %s3167_s12  }
  0x14   :  { %s3168_s15 = smov [#allocation4]   ;;  %s3069_s19 = scalar_lea.hbm %s3725_s0, 1024 }
  0x15   :  { %s21_s16 = sshll.u32 %s3168_s15, 4  ;;  %p3070_p8 = scmp.ne.s32.totalorder %s3725_s0, %s3069_s19  ;;  %s22_s16 = int_to_ptr.vmem [resolvable:$true] %s21_s16 }
  0x16   :  { %p3073_p9 = scmp.lt.u32.totalorder %s3069_s19, %s3725_s0 }
  0x18   :  { %p3075_p10 = pnand %p3073_p9, %p3070_p8 }
  0x1a   :  { %3078 = shalt.err (!%p3075_p10)
}
  0x1b   :  { %s3079_s24 = scalar_lea.vmem %s22_s16, 1024  ;;  %p3084_p12 = scmp.lt.s32.totalorder %s22_s16, %s22_s16 }
  0x1c   :  { %p3080_p11 = scmp.ne.s32.totalorder %s22_s16, %s3079_s24  ;;  %p3085_p13 = scmp.lt.s32.totalorder %s3079_s24, %s3079_s24 }
  0x1e   :  { %p3086_p0 = por %p3085_p13, %p3084_p12 }
  0x20   :  { %p3087_p1 = pnand %p3086_p0, %p3080_p11 }
  0x22   :  { %3090 = shalt.err (!%p3087_p1)
}
  0x23   :  { %s3169_s1 = smov 128   ;;  %s3170_s25 = smov 8  }
  0x24   :  { %27 = dma.hbm_to_vmem [thread:$0]  %s3725_s0, 1024, %s22_s16, [#allocation5], %s3169_s1, %s3169_s1, %s3170_s25  }
  0x25   :  { %s3171_s28 = smov [#allocation9]   ;;  %s3172_s30 = smov [#allocation10]  }
  0x26   :  { %s45_s29 = sshll.u32 %s3171_s28, 4  ;;  %s61_s8 = sshll.u32 %s3172_s30, 4  ;;  %s46_s29 = int_to_ptr.vmem [resolvable:$true] %s45_s29  ;;  %s3247_s8 = int_to_ptr.vmem [resolvable:$true] %s61_s8 }
  0x27   :  { %s3091_s13 = scalar_lea.hbm %s3727_s2, 6144 }
  0x28   :  { %p3092_p2 = scmp.ne.s32.totalorder %s3727_s2, %s3091_s13  ;;  %p3095_p3 = scmp.lt.u32.totalorder %s3091_s13, %s3727_s2 }
  0x2a   :  { %p3097_p4 = pnand %p3095_p3, %p3092_p2 }
  0x2c   :  { %3100 = shalt.err (!%p3097_p4)
}
  0x2d   :  { %s3101_s0 = scalar_lea.vmem %s46_s29, 6144  ;;  %p3106_p6 = scmp.lt.s32.totalorder %s46_s29, %s46_s29 }
  0x2e   :  { %p3102_p5 = scmp.ne.s32.totalorder %s46_s29, %s3101_s0  ;;  %p3107_p7 = scmp.lt.s32.totalorder %s3101_s0, %s3101_s0 }
  0x30   :  { %p3108_p8 = por %p3107_p7, %p3106_p6 }
  0x32   :  { %p3109_p9 = pnand %p3108_p8, %p3102_p5 }
  0x34   :  { %3112 = shalt.err (!%p3109_p9)
}
  0x35   :  { %51 = dma.hbm_to_vmem [thread:$0]  %s3727_s2, 6144, %s46_s29, [#allocation8], %s3166_s11, %s3166_s11, %s3167_s12  }
  0x36   :  { %s3113_s22 = scalar_lea.hbm %s3730_s5, 2048 }
  0x37   :  { %p3114_p10 = scmp.ne.s32.totalorder %s3730_s5, %s3113_s22  ;;  %p3117_p11 = scmp.lt.u32.totalorder %s3113_s22, %s3730_s5 }
  0x39   :  { %p3119_p12 = pnand %p3117_p11, %p3114_p10 }
  0x3b   :  { %3122 = shalt.err (!%p3119_p12)
}
  0x3c   :  { %s3123_s28 = scalar_lea.vmem %s3247_s8, 2048  ;;  %p3128_p0 = scmp.lt.s32.totalorder %s3247_s8, %s3247_s8 }
  0x3d   :  { %p3124_p13 = scmp.ne.s32.totalorder %s3247_s8, %s3123_s28  ;;  %p3129_p1 = scmp.lt.s32.totalorder %s3123_s28, %s3123_s28 }
  0x3f   :  { %p3130_p2 = por %p3129_p1, %p3128_p0 }
  0x41   :  { %p3131_p3 = pnand %p3130_p2, %p3124_p13 }
  0x43   :  { %3134 = shalt.err (!%p3131_p3)
}
  0x44   :  { %67 = dma.hbm_to_vmem [thread:$0]  %s3730_s5, 2048, %s3247_s8, [#allocation11], %s3169_s1, %s3169_s1, %s3170_s25  }
  0x45   :  { %3157 = dma.done.wait [#allocation5], 1024  }
  0x46   :  { %3158 = vsyncadd [#allocation5], 4294966272 }
  0x47   :  { %3159 = dma.done.wait [#allocation8], 6912  }
  0x48   :  { %3160 = vsyncadd [#allocation8], 4294960384 }
  0x49   :  { %3161 = dma.done.wait [#allocation11], 2048  }
  0x4a   :  { %3162 = vsyncadd [#allocation11], 4294965248  ;;  %v3173_v0 = vmov 0.0   ;;  %v96_v1 = vld [vmem:[#allocation7 + $0x8] sm:$0xff]  ;;  %v99_v2 = vld [vmem:[#allocation7 + $0x20] sm:$0xff]  ;;  %vm118_vm0 = vcmask 130048  }
  0x4b   :  { %207 = vmatprep.mubr.f32.mxu0 %v3173_v0  ;;  %v95_v3 = vld [vmem:[#allocation7] sm:$0xff]  ;;  %v2443_v4 = vpack.c.bf16 %v99_v2, %v96_v1  ;;  %v98_v5 = vld [vmem:[#allocation7 + $0x18] sm:$0xff]  ;;  %v389_v9 = vld [vmem:[#allocation9 + $0x20] sm:$0xff]  ;;  %v3174_v48 = vmov 0.0|0.0   ;;  %vm3175_vm1 = vmmov 0   ;;  %s3176_s29 = smov [#allocation12]  }
  0x4c   :  { %v87_v6 = vld [vmem:[#allocation4] sm:$0xff]  ;;  %v386_v7 = vld [vmem:[#allocation9 + $0x8] sm:$0xff]  ;;  %v2445_v8 = vpack.c.bf16 %v98_v5, %v95_v3  ;;  %v385_v10 = vld [vmem:[#allocation9] sm:$0xff]  ;;  %s1897_s30 = sshll.u32 %s3176_s29, 4  ;;  %s1898_s30 = int_to_ptr.vmem [resolvable:$true] %s1897_s30 }
  0x4d   :  { %v388_v11 = vld [vmem:[#allocation9 + $0x18] sm:$0xff]  ;;  %2116 = vmatprep.mubr.msk.f32.mxu1 %vm118_vm0, %v87_v6  ;;  %2444 = vmatprep.subr.bf16.mxu0 %v2443_v4  ;;  %v3286_v12 = vpack.c.bf16 %v389_v9, %v386_v7  ;;  %v395_v14 = vld [vmem:[#allocation9 + $0x50] sm:$0xff]  ;;  %v394_v18 = vld [vmem:[#allocation9 + $0x48] sm:$0xff]  ;;  %s3135_s8 = scalar_lea.vmem %s1898_s30, 128  ;;  %p3140_p5 = scmp.lt.s32.totalorder %s1898_s30, %s1898_s30 }
  0x4e   :  { %v392_v13 = vld [vmem:[#allocation9 + $0x38] sm:$0xff]  ;;  %2446 = vmatpush1.bf16.msra.mxu0 %v2445_v8  ;;  %v3288_v15 = vpack.c.bf16 %v388_v11, %v385_v10  ;;  %v391_v17 = vld [vmem:[#allocation9 + $0x30] sm:$0xff]  ;;  %v398_v19 = vld [vmem:[#allocation9 + $0x68] sm:$0xff]  ;;  %p3136_p4 = scmp.ne.s32.totalorder %s1898_s30, %s3135_s8  ;;  %p3141_p6 = scmp.lt.s32.totalorder %s3135_s8, %s3135_s8 }
  0x4f   :  { %2452 = vmatprep.subr.bf16.mxu0 %v3286_v12  ;;  %v3291_v16 = vpack.c.bf16 %v395_v14, %v392_v13  ;;  %v401_v20 = vld [vmem:[#allocation9 + $0x80] sm:$0xff]  ;;  %v88_v21 = vld [vmem:[#allocation4 + $0x8] sm:$0xff]  ;;  %v3296_v22 = vpack.c.bf16 %v394_v18, %v391_v17  ;;  %v407_v27 = vld [vmem:[#allocation9 + $0xb0] sm:$0xff] }
  0x50   :  { %v3299_v23 = vpack.c.bf16 %v401_v20, %v398_v19  ;;  %v397_v24 = vld [vmem:[#allocation9 + $0x60] sm:$0xff]  ;;  %v400_v25 = vld [vmem:[#allocation9 + $0x78] sm:$0xff]  ;;  %v403_v34 = vld [vmem:[#allocation9 + $0x90] sm:$0xff]  ;;  %p3142_p7 = por %p3141_p6, %p3140_p5 }
  0x51   :  { %1915 = vmatmul.mubr.msk.f32.vlgmr.msra.gmra.mrb[0].mxu0 %vm118_vm0, %v87_v6  ;;  %v404_v26 = vld [vmem:[#allocation9 + $0x98] sm:$0xff]  ;;  %v97_v28 = vld [vmem:[#allocation7 + $0x10] sm:$0xff]  ;;  %v3304_v31 = vpack.c.bf16 %v400_v25, %v397_v24  ;;  %v406_v35 = vld [vmem:[#allocation9 + $0xa8] sm:$0xff] }
  0x52   :  { %2454 = vmatpush1.bf16.msra.mxu0 %v3288_v15  ;;  %213 = vmatprep.mubr.f32.mxu0 %v3173_v0  ;;  %v100_v29 = vld [vmem:[#allocation7 + $0x28] sm:$0xff]  ;;  %v89_v30 = vld [vmem:[#allocation4 + $0x10] sm:$0xff]  ;;  %v3307_v33 = vpack.c.bf16 %v407_v27, %v404_v26  ;;  %v387_v36 = vld [vmem:[#allocation9 + $0x10] sm:$0xff]  ;;  %v3314_v42 = vpack.c.bf16 %v406_v35, %v403_v34  ;;  %v103_v35 = vlaneseq  ;;  %p3143_p8 = pnand %p3142_p7, %p3136_p4 }
  0x53   :  { %2456 = vmatprep.subr.bf16.mxu0 %v3291_v16  ;;  %v2447_v32 = vpack.c.bf16 %v100_v29, %v97_v28  ;;  %v410_v37 = vld [vmem:[#allocation9 + $0xc8] sm:$0xff]  ;;  %v413_v38 = vld [vmem:[#allocation9 + $0xe0] sm:$0xff]  ;;  %v396_v44 = vld [vmem:[#allocation9 + $0x58] sm:$0xff] }
  0x54   :  { %v390_v39 = vld [vmem:[#allocation9 + $0x28] sm:$0xff]  ;;  %v393_v43 = vld [vmem:[#allocation9 + $0x40] sm:$0xff]  ;;  %v3317_v45 = vpack.c.bf16 %v413_v38, %v410_v37  ;;  %v412_v47 = vld [vmem:[#allocation9 + $0xd8] sm:$0xff] }
  0x55   :  { %1916 = vmatmul.mubr.msk.f32.gmra.mrb[2].mxu0 %vm118_vm0, %v88_v21  ;;  %2448 = vmatprep.subr.bf16.mxu1 %v2447_v32  ;;  %v3310_v40 = vpack.c.bf16 %v390_v39, %v387_v36  ;;  %v90_v41 = vld [vmem:[#allocation4 + $0x18] sm:$0xff]  ;;  %v409_v46 = vld [vmem:[#allocation9 + $0xc0] sm:$0xff]  ;;  %v416_v49 = vld [vmem:[#allocation9 + $0xf8] sm:$0xff]  ;;  %v3323_v51 = vpack.c.bf16 %v396_v44, %v393_v43  ;;  %v104_v36 = vshrl.u32 %v103_v35, 7 }
  0x56   :  { %2458 = vmatpush1.bf16.msra.mxu0 %v3296_v22  ;;  %219 = vmatprep.mubr.f32.mxu0 %v3173_v0  ;;  %v419_v50 = vld [vmem:[#allocation9 + $0x110] sm:$0xff]  ;;  %v3327_v53 = vpack.c.bf16 %v412_v47, %v409_v46  ;;  %v402_v55 = vld [vmem:[#allocation9 + $0x88] sm:$0xff]  ;;  %v425_v60 = vld [vmem:[#allocation9 + $0x140] sm:$0xff] }
  0x57   :  { %2460 = vmatprep.subr.bf16.mxu0 %v3299_v23  ;;  %2450 = vmatpush3.bf16.msra.mxu1 %v2447_v32  ;;  %v91_v52 = vld [vmem:[#allocation4 + $0x20] sm:$0xff]  ;;  %v3330_v56 = vpack.c.bf16 %v419_v50, %v416_v49  ;;  %v418_v58 = vld [vmem:[#allocation9 + $0x108] sm:$0xff]  ;;  %v92_v62 = vld [vmem:[#allocation4 + $0x28] sm:$0xff]  ;;  %v113_v37 = vsub.s32 2, %v104_v36 }
  0x58   :  { %2483 = vmatprep.subr.bf16.mxu1 %v3174_v48  ;;  %v399_v54 = vld [vmem:[#allocation9 + $0x70] sm:$0xff]  ;;  %v422_v59 = vld [vmem:[#allocation9 + $0x128] sm:$0xff]  ;;  %v405_v1 = vld [vmem:[#allocation9 + $0xa0] sm:$0xff] }
  0x59   :  { %1917 = vmatmul.mubr.msk.f32.gmra.mrb[4].mxu0 %vm118_vm0, %v89_v30  ;;  %v415_v57 = vld [vmem:[#allocation9 + $0xf0] sm:$0xff]  ;;  %v3336_v61 = vpack.c.bf16 %v402_v55, %v399_v54  ;;  %v408_v2 = vld [vmem:[#allocation9 + $0xb8] sm:$0xff]  ;;  %v3343_v3 = vpack.c.bf16 %v425_v60, %v422_v59  ;;  %v421_v4 = vld [vmem:[#allocation9 + $0x120] sm:$0xff]  ;;  %v109_v55 = vsub.s32 1, %v104_v36 }
  0x5a   :  { %2462 = vmatpush1.bf16.msra.mxu0 %v3304_v31  ;;  %225 = vmatprep.mubr.f32.mxu0 %v3173_v0  ;;  %v3340_v63 = vpack.c.bf16 %v418_v58, %v415_v57  ;;  %v424_v5 = vld [vmem:[#allocation9 + $0x138] sm:$0xff]  ;;  %v431_v7 = vld [vmem:[#allocation9 + $0x170] sm:$0xff]  ;;  %v3349_v8 = vpack.c.bf16 %v408_v2, %v405_v1  ;;  %v93_v9 = vld [vmem:[#allocation4 + $0x30] sm:$0xff] }
  0x5b   :  { %2464 = vmatprep.subr.bf16.mxu0 %v3307_v33  ;;  %2117 = vmatmul.mubr.msk.f32.vlgmr.msra.gmra.mrb[0].mxu1 %vm118_vm0, %v88_v21  ;;  %v428_v6 = vld [vmem:[#allocation9 + $0x158] sm:$0xff]  ;;  %v3353_v10 = vpack.c.bf16 %v424_v5, %v421_v4  ;;  %v411_v11 = vld [vmem:[#allocation9 + $0xd0] sm:$0xff]  ;;  %v414_v13 = vld [vmem:[#allocation9 + $0xe8] sm:$0xff] }
  0x5c   :  { %2485 = vmatpush3.bf16.msra.mxu1 %v3310_v40  ;;  %2119 = vmatprep.mubr.msk.f32.mxu1 %vm118_vm0, %v89_v30  ;;  %v3356_v14 = vpack.c.bf16 %v431_v7, %v428_v6  ;;  %v427_v17 = vld [vmem:[#allocation9 + $0x150] sm:$0xff]  ;;  %v430_v18 = vld [vmem:[#allocation9 + $0x168] sm:$0xff]  ;;  %v3362_v19 = vpack.c.bf16 %v414_v13, %v411_v11  ;;  %v417_v24 = vld [vmem:[#allocation9 + $0x100] sm:$0xff] }
  0x5d   :  { %1918 = vmatmul.mubr.msk.f32.gmra.mrb[6].mxu0 %vm118_vm0, %v90_v41  ;;  %2486 = vmatprep.subr.bf16.mxu1 %v3174_v48  ;;  %v94_v20 = vld [vmem:[#allocation4 + $0x38] sm:$0xff]  ;;  %v3366_v21 = vpack.c.bf16 %v430_v18, %v427_v17  ;;  %v420_v25 = vld [vmem:[#allocation9 + $0x118] sm:$0xff]  ;;  %v423_v27 = vld [vmem:[#allocation9 + $0x130] sm:$0xff] }
  0x5e   :  { %2466 = vmatpush1.bf16.msra.mxu0 %v3314_v42  ;;  %231 = vmatprep.mubr.f32.mxu0 %v3173_v0  ;;  %v3373_v26 = vpack.c.bf16 %v420_v25, %v417_v24  ;;  %v426_v28 = vld [vmem:[#allocation9 + $0x148] sm:$0xff]  ;;  %v429_v30 = vld [vmem:[#allocation9 + $0x160] sm:$0xff]  ;;  %v432_v32 = vld [vmem:[#allocation9 + $0x178] sm:$0xff] }
  0x5f   :  { %2468 = vmatprep.subr.bf16.mxu0 %v3317_v45  ;;  %2120 = vmatmul.mubr.msk.f32.gmra.mrb[2].mxu1 %vm118_vm0, %v90_v41  ;;  %v3383_v29 = vpack.c.bf16 %v426_v28, %v423_v27  ;;  %v3392_v34 = vpack.c.bf16 %v432_v32, %v429_v30  ;;  %v101_v38 = vld [vmem:[%s3728_s3] sm:$0x7] }
  0x60   :  { %2488 = vmatpush3.bf16.msra.mxu1 %v3323_v51  ;;  %2122 = vmatprep.mubr.msk.f32.mxu1 %vm118_vm0, %v91_v52  ;;  %v114_v39 = vrot.slane %v101_v38, %v113_v37  ;;  %v3445_v2 = vrot.slane %v101_v38, %v109_v55  ;;  %v3456_v28 = vld [vmem:[%s3729_s4] ss:$0 sm:$0xff] }
  0x61   :  { %1919 = vmatmul.mubr.msk.f32.gmra.mrb[8].mxu0 %vm118_vm0, %v91_v52  ;;  %2489 = vmatprep.subr.bf16.mxu1 %v3174_v48  ;;  %v105_v52 = vsub.s32 0, %v104_v36 }
  0x62   :  { %2470 = vmatpush1.bf16.msra.mxu0 %v3327_v53  ;;  %237 = vmatprep.mubr.f32.mxu0 %v3173_v0 }
  0x63   :  { %2472 = vmatprep.subr.bf16.mxu0 %v3330_v56  ;;  %2123 = vmatmul.mubr.msk.f32.gmra.mrb[4].mxu1 %vm118_vm0, %v92_v62  ;;  %v3441_v59 = vrot.slane %v101_v38, %v105_v52 }
  0x64   :  { %2491 = vmatpush3.bf16.msra.mxu1 %v3336_v61  ;;  %2125 = vmatprep.mubr.msk.f32.mxu1 %vm118_vm0, %v93_v9 }
  0x65   :  { %1920 = vmatmul.mubr.msk.f32.gmra.mrb[10].mxu0 %vm118_vm0, %v92_v62  ;;  %2492 = vmatprep.subr.bf16.mxu1 %v3174_v48 }
  0x66   :  { %2474 = vmatpush1.bf16.msra.mxu0 %v3340_v63  ;;  %243 = vmatprep.mubr.f32.mxu0 %v3173_v0 }
  0x67   :  { %2476 = vmatprep.subr.bf16.mxu0 %v3343_v3  ;;  %2126 = vmatmul.mubr.msk.f32.gmra.mrb[6].mxu1 %vm118_vm0, %v94_v20 }
  0x68   :  { %2494 = vmatpush3.bf16.msra.mxu1 %v3349_v8  ;;  %2160 = vmatprep.mubr.msk.f32.mxu1 %vm3175_vm1, %v3173_v0 }
  0x69   :  { %1921 = vmatmul.mubr.msk.f32.gmra.mrb[12].mxu0 %vm118_vm0, %v93_v9  ;;  %2495 = vmatprep.subr.bf16.mxu1 %v3174_v48 }
  0x6a   :  { %2478 = vmatpush1.bf16.msra.mxu0 %v3353_v10  ;;  %249 = vmatprep.mubr.f32.mxu0 %v3173_v0 }
  0x6b   :  { %2480 = vmatprep.subr.bf16.mxu0 %v3356_v14 }
  0x6c   :  { %2497 = vmatpush3.bf16.msra.mxu1 %v3362_v19 }
  0x6d   :  { %1922 = vmatmul.mubr.msk.f32.gmra.mrb[14].mxu0 %vm118_vm0, %v94_v20  ;;  %2498 = vmatprep.subr.bf16.mxu1 %v3174_v48 }
  0x6e   :  { %2482 = vmatpush1.bf16.msra.mxu0 %v3366_v21  ;;  %499 = vmatprep.mubr.f32.mxu0 %v3173_v0 }
  0x6f   :  { %2508 = vmatprep.subr.bf16.mxu0 %v3286_v12 }
  0x70   :  { %2500 = vmatpush3.bf16.msra.mxu1 %v3373_v26 }
  0x71   :  { %500 = vmatmul.mubr.f32.vlgmr.msra.gmra.mrb[0].mxu0 %v3173_v0  ;;  %2501 = vmatprep.subr.bf16.mxu1 %v3174_v48 }
  0x72   :  { %2510 = vmatpush1.bf16.msra.mxu0 %v3288_v15  ;;  %674 = vmatprep.mubr.f32.mxu0 %v3173_v0 }
  0x73   :  { %2512 = vmatprep.subr.bf16.mxu0 %v3291_v16 }
  0x74   :  { %2503 = vmatpush3.bf16.msra.mxu1 %v3383_v29 }
  0x75   :  { %2504 = vmatprep.subr.bf16.mxu1 %v3174_v48 }
  0x76   :  { %2514 = vmatpush1.bf16.msra.mxu0 %v3296_v22 }
  0x77   :  { %2516 = vmatprep.subr.bf16.mxu0 %v3299_v23 }
  0x78   :  { %2506 = vmatpush3.bf16.msra.mxu1 %v3392_v34 }
  0x79   :  { %2539 = vmatprep.subr.bf16.mxu1 %v3174_v48 }
  0x7a   :  { %2518 = vmatpush1.bf16.msra.mxu0 %v3304_v31 }
  0x7b   :  { %2161 = vmatmul.mubr.f32.vlgmr.msra.gmra.mrb[8].mxu1 %v3173_v0  ;;  %2520 = vmatprep.subr.bf16.mxu0 %v3307_v33 }
  0x7c   :  { %2541 = vmatpush3.bf16.msra.mxu1 %v3310_v40  ;;  %2195 = vmatprep.mubr.msk.f32.mxu1 %vm3175_vm1, %v3173_v0 }
  0x7d   :  { %2542 = vmatprep.subr.bf16.mxu1 %v3174_v48 }
  0x7e   :  { %2522 = vmatpush1.bf16.msra.mxu0 %v3314_v42 }
  0x7f   :  { %2524 = vmatprep.subr.bf16.mxu0 %v3317_v45 }
  0x80   :  { %2544 = vmatpush3.bf16.msra.mxu1 %v3323_v51 }
  0x81   :  { %2545 = vmatprep.subr.bf16.mxu1 %v3174_v48 }
  0x82   :  { %2526 = vmatpush1.bf16.msra.mxu0 %v3327_v53 }
  0x83   :  { %2528 = vmatprep.subr.bf16.mxu0 %v3330_v56 }
  0x84   :  { %2547 = vmatpush3.bf16.msra.mxu1 %v3336_v61 }
  0x85   :  { %2548 = vmatprep.subr.bf16.mxu1 %v3174_v48 }
  0x86   :  { %2530 = vmatpush1.bf16.msra.mxu0 %v3340_v63 }
  0x87   :  { %2532 = vmatprep.subr.bf16.mxu0 %v3343_v3 }
  0x88   :  { %2550 = vmatpush3.bf16.msra.mxu1 %v3349_v8 }
  0x89   :  { %2551 = vmatprep.subr.bf16.mxu1 %v3174_v48 }
  0x8a   :  { %2534 = vmatpush1.bf16.msra.mxu0 %v3353_v10 }
  0x8b   :  { %2536 = vmatprep.subr.bf16.mxu0 %v3356_v14 }
  0x8c   :  { %2553 = vmatpush3.bf16.msra.mxu1 %v3362_v19 }
  0x8d   :  { %2554 = vmatprep.subr.bf16.mxu1 %v3174_v48 }
  0x8e   :  { %2538 = vmatpush1.bf16.msra.mxu0 %v3366_v21 }
  0x8f   :  { %2564 = vmatprep.subr.bf16.mxu0 %v3286_v12 }
  0x90   :  { %2556 = vmatpush3.bf16.msra.mxu1 %v3373_v26 }
  0x91   :  { %2557 = vmatprep.subr.bf16.mxu1 %v3174_v48 }
  0x94   :  { %2559 = vmatpush3.bf16.msra.mxu1 %v3383_v29 }
  0x95   :  { %2560 = vmatprep.subr.bf16.mxu1 %v3174_v48 }
  0x98   :  { %2562 = vmatpush3.bf16.msra.mxu1 %v3392_v34 }
  0x99   :  { %2595 = vmatprep.subr.bf16.mxu1 %v3174_v48 }
 0x12e   :  { %v2118_v41 = vpop.f32.mrb[0].mxu1 }
 0x12f   :  { %v3433_v43 = vadd.f32 %v2118_v41, %v114_v39  ;;  %v322_v44 = vpop.f32.mrb[1].mxu1 }
 0x130   :  { %v323_v36 = vadd.f32 %v322_v44, %v114_v39 }
 0x132   :  { %v2121_v46 = vpop.f32.mrb[2].mxu1 }
 0x133   :  { %v3435_v47 = vadd.f32 %v2121_v46, %v114_v39  ;;  %v332_v49 = vpop.f32.mrb[3].mxu1 }
 0x134   :  { %v3437_v50 = vadd.f32 %v332_v49, %v114_v39 }
 0x136   :  { %v2124_v54 = vpop.f32.mrb[4].mxu1 }
 0x137   :  { %v3439_v57 = vadd.f32 %v2124_v54, %v114_v39  ;;  %v342_v58 = vpop.f32.mrb[5].mxu1 }
 0x138   :  { %v3443_v60 = vadd.f32 %v342_v58, %v114_v39 }
 0x13a   :  { %v2127_v62 = vpop.f32.mrb[6].mxu1 }
 0x13b   :  { %v3447_v4 = vadd.f32 %v2127_v62, %v114_v39  ;;  %v352_v5 = vpop.f32.mrb[7].mxu1 }
 0x13c   :  { %v3450_v9 = vadd.f32 %v352_v5, %v114_v39 }
 0x144   :  { %v501_v1 = vpop.f32.mrb[0].mxu0 }
 0x145   :  { %v2923_v6 = vadd.f32 %v501_v1, %v3441_v59  ;;  %v503_v7 = vpop.f32.mrb[1].mxu0 }
 0x146   :  { %v2924_v13 = vadd.f32 %v503_v7, %v3445_v2 }
 0x147   :  { %v1931_v11 = vmul.f32 -1.442695, %v2923_v6 }
 0x148   :  { %v1932_v17 = vmul.f32 -1.442695, %v2924_v13 }
 0x149   :  { %2967 = vpow2.f32 %v1931_v11 }
 0x14a   :  { %2969 = vpow2.f32 %v1932_v17 }
 0x14e   :  { %v572_v18 = vpop.f32.mrb[8].mxu1 }
 0x14f   :  { %v2162_v20 = vpop.f32.mrb[9].mxu1  ;;  %v602_v32 = vadd.f32 %v3456_v28, %v572_v18 }
 0x153   :  { %v2968_v24 = vpop.eup %2967 }
 0x154   :  { %v590_v25 = vadd.f32 1.0, %v2968_v24  ;;  %v2970_v27 = vpop.eup %2969 }
 0x155   :  { %v591_v30 = vadd.f32 1.0, %v2970_v27 }
 0x156   :  { %2971 = vrcp.f32 %v590_v25 }
 0x157   :  { %2973 = vrcp.f32 %v591_v30 }
 0x160   :  { %v2972_v35 = vpop.eup %2971 }
 0x161   :  { %v603_v37 = vmul.f32 %v2972_v35, %v602_v32  ;;  %v2974_v41 = vpop.eup %2973 }
 0x162   :  { %v606_v46 = vsub.f32 1.0, %v2974_v41  ;;  %v608_v54 = vmul.f32 0.0, %v2974_v41 }
 0x163   :  { %v604_v38 = vadd.f32 %v603_v37, %v323_v36 }
 0x165   :  { %2975 = vtanh.f32 %v604_v38 }
 0x16f   :  { %v2976_v49 = vpop.eup %2975 }
 0x170   :  { %v607_v52 = vmul.f32 %v2976_v49, %v606_v46 }
 0x172   :  { %v609_v55 = vadd.f32 %v608_v54, %v607_v52 }
 0x174   :  { %675 = vmatmul.mubr.f32.vlgmr.msra.gmra.mrb[2].mxu0 %v609_v55  ;;  %2196 = vmatmul.mubr.f32.vlgmr.msra.gmra.mrb[10].mxu1 %v609_v55 }
 0x175   :  { %2566 = vmatpush1.bf16.msra.mxu0 %v3288_v15  ;;  %2597 = vmatpush3.bf16.msra.mxu1 %v3310_v40 }
 0x176   :  { %2568 = vmatprep.subr.bf16.mxu0 %v3291_v16  ;;  %2598 = vmatprep.subr.bf16.mxu1 %v3174_v48 }
 0x177   :  { %843 = vmatprep.mubr.f32.mxu0 %v3173_v0  ;;  %2230 = vmatprep.mubr.msk.f32.mxu1 %vm3175_vm1, %v3173_v0 }
 0x179   :  { %2570 = vmatpush1.bf16.msra.mxu0 %v3296_v22  ;;  %2600 = vmatpush3.bf16.msra.mxu1 %v3323_v51 }
 0x17a   :  { %2572 = vmatprep.subr.bf16.mxu0 %v3299_v23  ;;  %2601 = vmatprep.subr.bf16.mxu1 %v3174_v48 }
 0x17d   :  { %2574 = vmatpush1.bf16.msra.mxu0 %v3304_v31  ;;  %2603 = vmatpush3.bf16.msra.mxu1 %v3336_v61 }
 0x17e   :  { %2576 = vmatprep.subr.bf16.mxu0 %v3307_v33  ;;  %2604 = vmatprep.subr.bf16.mxu1 %v3174_v48 }
 0x181   :  { %2578 = vmatpush1.bf16.msra.mxu0 %v3314_v42  ;;  %2606 = vmatpush3.bf16.msra.mxu1 %v3349_v8 }
 0x182   :  { %2580 = vmatprep.subr.bf16.mxu0 %v3317_v45  ;;  %2607 = vmatprep.subr.bf16.mxu1 %v3174_v48 }
 0x185   :  { %2582 = vmatpush1.bf16.msra.mxu0 %v3327_v53  ;;  %2609 = vmatpush3.bf16.msra.mxu1 %v3362_v19 }
 0x186   :  { %2584 = vmatprep.subr.bf16.mxu0 %v3330_v56  ;;  %2610 = vmatprep.subr.bf16.mxu1 %v3174_v48 }
 0x189   :  { %2586 = vmatpush1.bf16.msra.mxu0 %v3340_v63  ;;  %2612 = vmatpush3.bf16.msra.mxu1 %v3373_v26 }
 0x18a   :  { %2588 = vmatprep.subr.bf16.mxu0 %v3343_v3  ;;  %2613 = vmatprep.subr.bf16.mxu1 %v3174_v48 }
 0x18d   :  { %2590 = vmatpush1.bf16.msra.mxu0 %v3353_v10  ;;  %2615 = vmatpush3.bf16.msra.mxu1 %v3383_v29 }
 0x18e   :  { %2592 = vmatprep.subr.bf16.mxu0 %v3356_v14  ;;  %2616 = vmatprep.subr.bf16.mxu1 %v3174_v48 }
 0x191   :  { %2594 = vmatpush1.bf16.msra.mxu0 %v3366_v21  ;;  %2618 = vmatpush3.bf16.msra.mxu1 %v3392_v34 }
 0x192   :  { %2620 = vmatprep.subr.bf16.mxu0 %v3286_v12  ;;  %2651 = vmatprep.subr.bf16.mxu1 %v3174_v48 }
 0x247   :  { %v676_v39 = vpop.f32.mrb[2].mxu0  ;;  %v747_v44 = vpop.f32.mrb[10].mxu1 }
 0x248   :  { %v2925_v58 = vadd.f32 %v676_v39, %v3441_v59  ;;  %v678_v62 = vpop.f32.mrb[3].mxu0  ;;  %v2197_v1 = vpop.f32.mrb[11].mxu1  ;;  %v771_v20 = vadd.f32 %v3456_v28, %v747_v44 }
 0x249   :  { %v2926_v6 = vadd.f32 %v678_v62, %v3445_v2 }
 0x24a   :  { %v1934_v5 = vmul.f32 -1.442695, %v2925_v58 }
 0x24b   :  { %v1935_v7 = vmul.f32 -1.442695, %v2926_v6 }
 0x24c   :  { %2977 = vpow2.f32 %v1934_v5 }
 0x24d   :  { %2979 = vpow2.f32 %v1935_v7 }
 0x256   :  { %v2978_v11 = vpop.eup %2977 }
 0x257   :  { %v765_v13 = vadd.f32 1.0, %v2978_v11  ;;  %v2980_v17 = vpop.eup %2979 }
 0x258   :  { %v766_v18 = vadd.f32 1.0, %v2980_v17 }
 0x259   :  { %2981 = vrcp.f32 %v765_v13 }
 0x25a   :  { %2983 = vrcp.f32 %v766_v18 }
 0x263   :  { %v2982_v24 = vpop.eup %2981 }
 0x264   :  { %v772_v25 = vmul.f32 %v2982_v24, %v771_v20  ;;  %v2984_v30 = vpop.eup %2983 }
 0x265   :  { %v775_v32 = vsub.f32 1.0, %v2984_v30  ;;  %v777_v37 = vmul.f32 %v2984_v30, %v609_v55 }
 0x266   :  { %v773_v27 = vadd.f32 %v772_v25, %v3433_v43 }
 0x268   :  { %2985 = vtanh.f32 %v773_v27 }
 0x272   :  { %v2986_v35 = vpop.eup %2985 }
 0x273   :  { %v776_v36 = vmul.f32 %v2986_v35, %v775_v32 }
 0x275   :  { %v778_v38 = vadd.f32 %v777_v37, %v776_v36 }
 0x277   :  { %844 = vmatmul.mubr.f32.vlgmr.msra.gmra.mrb[4].mxu0 %v778_v38  ;;  %2231 = vmatmul.mubr.f32.vlgmr.msra.gmra.mrb[12].mxu1 %v778_v38 }
 0x278   :  { %2622 = vmatpush1.bf16.msra.mxu0 %v3288_v15  ;;  %2653 = vmatpush3.bf16.msra.mxu1 %v3310_v40 }
 0x279   :  { %2624 = vmatprep.subr.bf16.mxu0 %v3291_v16  ;;  %2654 = vmatprep.subr.bf16.mxu1 %v3174_v48 }
 0x27a   :  { %1012 = vmatprep.mubr.f32.mxu0 %v3173_v0  ;;  %2265 = vmatprep.mubr.msk.f32.mxu1 %vm3175_vm1, %v3173_v0 }
 0x27c   :  { %2626 = vmatpush1.bf16.msra.mxu0 %v3296_v22  ;;  %2656 = vmatpush3.bf16.msra.mxu1 %v3323_v51 }
 0x27d   :  { %2628 = vmatprep.subr.bf16.mxu0 %v3299_v23  ;;  %2657 = vmatprep.subr.bf16.mxu1 %v3174_v48 }
 0x280   :  { %2630 = vmatpush1.bf16.msra.mxu0 %v3304_v31  ;;  %2659 = vmatpush3.bf16.msra.mxu1 %v3336_v61 }
 0x281   :  { %2632 = vmatprep.subr.bf16.mxu0 %v3307_v33  ;;  %2660 = vmatprep.subr.bf16.mxu1 %v3174_v48 }
 0x284   :  { %2634 = vmatpush1.bf16.msra.mxu0 %v3314_v42  ;;  %2662 = vmatpush3.bf16.msra.mxu1 %v3349_v8 }
 0x285   :  { %2636 = vmatprep.subr.bf16.mxu0 %v3317_v45  ;;  %2663 = vmatprep.subr.bf16.mxu1 %v3174_v48 }
 0x288   :  { %2638 = vmatpush1.bf16.msra.mxu0 %v3327_v53  ;;  %2665 = vmatpush3.bf16.msra.mxu1 %v3362_v19 }
 0x289   :  { %2640 = vmatprep.subr.bf16.mxu0 %v3330_v56  ;;  %2666 = vmatprep.subr.bf16.mxu1 %v3174_v48 }
 0x28c   :  { %2642 = vmatpush1.bf16.msra.mxu0 %v3340_v63  ;;  %2668 = vmatpush3.bf16.msra.mxu1 %v3373_v26 }
 0x28d   :  { %2644 = vmatprep.subr.bf16.mxu0 %v3343_v3  ;;  %2669 = vmatprep.subr.bf16.mxu1 %v3174_v48 }
 0x290   :  { %2646 = vmatpush1.bf16.msra.mxu0 %v3353_v10  ;;  %2671 = vmatpush3.bf16.msra.mxu1 %v3383_v29 }
 0x291   :  { %2648 = vmatprep.subr.bf16.mxu0 %v3356_v14  ;;  %2672 = vmatprep.subr.bf16.mxu1 %v3174_v48 }
 0x294   :  { %2650 = vmatpush1.bf16.msra.mxu0 %v3366_v21  ;;  %2674 = vmatpush3.bf16.msra.mxu1 %v3392_v34 }
 0x295   :  { %2676 = vmatprep.subr.bf16.mxu0 %v3286_v12  ;;  %2707 = vmatprep.subr.bf16.mxu1 %v3174_v48 }
 0x34a   :  { %v845_v43 = vpop.f32.mrb[4].mxu0  ;;  %v916_v41 = vpop.f32.mrb[12].mxu1 }
 0x34b   :  { %v2927_v46 = vadd.f32 %v845_v43, %v3441_v59  ;;  %v847_v49 = vpop.f32.mrb[5].mxu0  ;;  %v2232_v52 = vpop.f32.mrb[13].mxu1  ;;  %v940_v5 = vadd.f32 %v3456_v28, %v916_v41 }
 0x34c   :  { %v2928_v55 = vadd.f32 %v847_v49, %v3445_v2 }
 0x34d   :  { %v1936_v54 = vmul.f32 -1.442695, %v2927_v46 }
 0x34e   :  { %v1937_v39 = vmul.f32 -1.442695, %v2928_v55 }
 0x34f   :  { %2987 = vpow2.f32 %v1936_v54 }
 0x350   :  { %2989 = vpow2.f32 %v1937_v39 }
 0x359   :  { %v2988_v44 = vpop.eup %2987 }
 0x35a   :  { %v934_v58 = vadd.f32 1.0, %v2988_v44  ;;  %v2990_v62 = vpop.eup %2989 }
 0x35b   :  { %v935_v1 = vadd.f32 1.0, %v2990_v62 }
 0x35c   :  { %2991 = vrcp.f32 %v934_v58 }
 0x35d   :  { %2993 = vrcp.f32 %v935_v1 }
 0x366   :  { %v2992_v6 = vpop.eup %2991 }
 0x367   :  { %v941_v7 = vmul.f32 %v2992_v6, %v940_v5  ;;  %v2994_v13 = vpop.eup %2993 }
 0x368   :  { %v944_v17 = vsub.f32 1.0, %v2994_v13  ;;  %v946_v24 = vmul.f32 %v2994_v13, %v778_v38 }
 0x369   :  { %v942_v11 = vadd.f32 %v941_v7, %v3437_v50 }
 0x36b   :  { %2995 = vtanh.f32 %v942_v11 }
 0x375   :  { %v2996_v18 = vpop.eup %2995 }
 0x376   :  { %v945_v20 = vmul.f32 %v2996_v18, %v944_v17 }
 0x378   :  { %v947_v25 = vadd.f32 %v946_v24, %v945_v20 }
 0x37a   :  { %1013 = vmatmul.mubr.f32.vlgmr.msra.gmra.mrb[6].mxu0 %v947_v25  ;;  %2266 = vmatmul.mubr.f32.vlgmr.msra.gmra.mrb[14].mxu1 %v947_v25 }
 0x37b   :  { %2678 = vmatpush1.bf16.msra.mxu0 %v3288_v15  ;;  %2709 = vmatpush3.bf16.msra.mxu1 %v3310_v40 }
 0x37c   :  { %2680 = vmatprep.subr.bf16.mxu0 %v3291_v16  ;;  %2710 = vmatprep.subr.bf16.mxu1 %v3174_v48 }
 0x37d   :  { %1181 = vmatprep.mubr.f32.mxu0 %v3173_v0  ;;  %2300 = vmatprep.mubr.msk.f32.mxu1 %vm3175_vm1, %v3173_v0 }
 0x37f   :  { %2682 = vmatpush1.bf16.msra.mxu0 %v3296_v22  ;;  %2712 = vmatpush3.bf16.msra.mxu1 %v3323_v51 }
 0x380   :  { %2684 = vmatprep.subr.bf16.mxu0 %v3299_v23  ;;  %2713 = vmatprep.subr.bf16.mxu1 %v3174_v48 }
 0x383   :  { %2686 = vmatpush1.bf16.msra.mxu0 %v3304_v31  ;;  %2715 = vmatpush3.bf16.msra.mxu1 %v3336_v61 }
 0x384   :  { %2688 = vmatprep.subr.bf16.mxu0 %v3307_v33  ;;  %2716 = vmatprep.subr.bf16.mxu1 %v3174_v48 }
 0x387   :  { %2690 = vmatpush1.bf16.msra.mxu0 %v3314_v42  ;;  %2718 = vmatpush3.bf16.msra.mxu1 %v3349_v8 }
 0x388   :  { %2692 = vmatprep.subr.bf16.mxu0 %v3317_v45  ;;  %2719 = vmatprep.subr.bf16.mxu1 %v3174_v48 }
 0x38b   :  { %2694 = vmatpush1.bf16.msra.mxu0 %v3327_v53  ;;  %2721 = vmatpush3.bf16.msra.mxu1 %v3362_v19 }
 0x38c   :  { %2696 = vmatprep.subr.bf16.mxu0 %v3330_v56  ;;  %2722 = vmatprep.subr.bf16.mxu1 %v3174_v48 }
 0x38f   :  { %2698 = vmatpush1.bf16.msra.mxu0 %v3340_v63  ;;  %2724 = vmatpush3.bf16.msra.mxu1 %v3373_v26 }
 0x390   :  { %2700 = vmatprep.subr.bf16.mxu0 %v3343_v3  ;;  %2725 = vmatprep.subr.bf16.mxu1 %v3174_v48 }
 0x393   :  { %2702 = vmatpush1.bf16.msra.mxu0 %v3353_v10  ;;  %2727 = vmatpush3.bf16.msra.mxu1 %v3383_v29 }
 0x394   :  { %2704 = vmatprep.subr.bf16.mxu0 %v3356_v14  ;;  %2728 = vmatprep.subr.bf16.mxu1 %v3174_v48 }
 0x397   :  { %2706 = vmatpush1.bf16.msra.mxu0 %v3366_v21  ;;  %2730 = vmatpush3.bf16.msra.mxu1 %v3392_v34 }
 0x398   :  { %2732 = vmatprep.subr.bf16.mxu0 %v3286_v12  ;;  %2763 = vmatprep.subr.bf16.mxu1 %v3174_v48 }
 0x44d   :  { %v1014_v50 = vpop.f32.mrb[6].mxu0  ;;  %v1085_v27 = vpop.f32.mrb[14].mxu1 }
 0x44e   :  { %v2929_v30 = vadd.f32 %v1014_v50, %v3441_v59  ;;  %v1016_v32 = vpop.f32.mrb[7].mxu0  ;;  %v2267_v35 = vpop.f32.mrb[15].mxu1  ;;  %v1109_v52 = vadd.f32 %v3456_v28, %v1085_v27 }
 0x44f   :  { %v2930_v37 = vadd.f32 %v1016_v32, %v3445_v2 }
 0x450   :  { %v1938_v36 = vmul.f32 -1.442695, %v2929_v30 }
 0x451   :  { %v1939_v38 = vmul.f32 -1.442695, %v2930_v37 }
 0x452   :  { %2997 = vpow2.f32 %v1938_v36 }
 0x453   :  { %2999 = vpow2.f32 %v1939_v38 }
 0x45c   :  { %v2998_v43 = vpop.eup %2997 }
 0x45d   :  { %v1103_v41 = vadd.f32 1.0, %v2998_v43  ;;  %v3000_v46 = vpop.eup %2999 }
 0x45e   :  { %v1104_v49 = vadd.f32 1.0, %v3000_v46 }
 0x45f   :  { %3001 = vrcp.f32 %v1103_v41 }
 0x460   :  { %3003 = vrcp.f32 %v1104_v49 }
 0x469   :  { %v3002_v54 = vpop.eup %3001 }
 0x46a   :  { %v1110_v55 = vmul.f32 %v3002_v54, %v1109_v52  ;;  %v3004_v44 = vpop.eup %3003 }
 0x46b   :  { %v1113_v58 = vsub.f32 1.0, %v3004_v44  ;;  %v1115_v5 = vmul.f32 %v3004_v44, %v947_v25 }
 0x46c   :  { %v1111_v39 = vadd.f32 %v1110_v55, %v3435_v47 }
 0x46e   :  { %3005 = vtanh.f32 %v1111_v39 }
 0x478   :  { %v3006_v62 = vpop.eup %3005 }
 0x479   :  { %v1114_v1 = vmul.f32 %v3006_v62, %v1113_v58 }
 0x47b   :  { %v1116_v6 = vadd.f32 %v1115_v5, %v1114_v1 }
 0x47d   :  { %1182 = vmatmul.mubr.f32.vlgmr.msra.gmra.mrb[8].mxu0 %v1116_v6  ;;  %2301 = vmatmul.mubr.f32.vlgmr.msra.gmra.mrb[16].mxu1 %v1116_v6 }
 0x47e   :  { %2734 = vmatpush1.bf16.msra.mxu0 %v3288_v15  ;;  %2765 = vmatpush3.bf16.msra.mxu1 %v3310_v40 }
 0x47f   :  { %2736 = vmatprep.subr.bf16.mxu0 %v3291_v16  ;;  %2766 = vmatprep.subr.bf16.mxu1 %v3174_v48 }
 0x480   :  { %1350 = vmatprep.mubr.f32.mxu0 %v3173_v0  ;;  %2335 = vmatprep.mubr.msk.f32.mxu1 %vm3175_vm1, %v3173_v0 }
 0x482   :  { %2738 = vmatpush1.bf16.msra.mxu0 %v3296_v22  ;;  %2768 = vmatpush3.bf16.msra.mxu1 %v3323_v51 }
 0x483   :  { %2740 = vmatprep.subr.bf16.mxu0 %v3299_v23  ;;  %2769 = vmatprep.subr.bf16.mxu1 %v3174_v48 }
 0x486   :  { %2742 = vmatpush1.bf16.msra.mxu0 %v3304_v31  ;;  %2771 = vmatpush3.bf16.msra.mxu1 %v3336_v61 }
 0x487   :  { %2744 = vmatprep.subr.bf16.mxu0 %v3307_v33  ;;  %2772 = vmatprep.subr.bf16.mxu1 %v3174_v48 }
 0x48a   :  { %2746 = vmatpush1.bf16.msra.mxu0 %v3314_v42  ;;  %2774 = vmatpush3.bf16.msra.mxu1 %v3349_v8 }
 0x48b   :  { %2748 = vmatprep.subr.bf16.mxu0 %v3317_v45  ;;  %2775 = vmatprep.subr.bf16.mxu1 %v3174_v48 }
 0x48e   :  { %2750 = vmatpush1.bf16.msra.mxu0 %v3327_v53  ;;  %2777 = vmatpush3.bf16.msra.mxu1 %v3362_v19 }
 0x48f   :  { %2752 = vmatprep.subr.bf16.mxu0 %v3330_v56  ;;  %2778 = vmatprep.subr.bf16.mxu1 %v3174_v48 }
 0x492   :  { %2754 = vmatpush1.bf16.msra.mxu0 %v3340_v63  ;;  %2780 = vmatpush3.bf16.msra.mxu1 %v3373_v26 }
 0x493   :  { %2756 = vmatprep.subr.bf16.mxu0 %v3343_v3  ;;  %2781 = vmatprep.subr.bf16.mxu1 %v3174_v48 }
 0x496   :  { %2758 = vmatpush1.bf16.msra.mxu0 %v3353_v10  ;;  %2783 = vmatpush3.bf16.msra.mxu1 %v3383_v29 }
 0x497   :  { %2760 = vmatprep.subr.bf16.mxu0 %v3356_v14  ;;  %2784 = vmatprep.subr.bf16.mxu1 %v3174_v48 }
 0x49a   :  { %2762 = vmatpush1.bf16.msra.mxu0 %v3366_v21  ;;  %2786 = vmatpush3.bf16.msra.mxu1 %v3392_v34 }
 0x49b   :  { %2788 = vmatprep.subr.bf16.mxu0 %v3286_v12  ;;  %2819 = vmatprep.subr.bf16.mxu1 %v3174_v48 }
 0x550   :  { %v1183_v47 = vpop.f32.mrb[8].mxu0  ;;  %v1254_v7 = vpop.f32.mrb[16].mxu1 }
 0x551   :  { %v2931_v11 = vadd.f32 %v1183_v47, %v3441_v59  ;;  %v1185_v13 = vpop.f32.mrb[9].mxu0  ;;  %v2302_v17 = vpop.f32.mrb[17].mxu1  ;;  %v1278_v32 = vadd.f32 %v3456_v28, %v1254_v7 }
 0x552   :  { %v2932_v20 = vadd.f32 %v1185_v13, %v3445_v2 }
 0x553   :  { %v1940_v18 = vmul.f32 -1.442695, %v2931_v11 }
 0x554   :  { %v1941_v24 = vmul.f32 -1.442695, %v2932_v20 }
 0x555   :  { %3007 = vpow2.f32 %v1940_v18 }
 0x556   :  { %3009 = vpow2.f32 %v1941_v24 }
 0x55f   :  { %v3008_v25 = vpop.eup %3007 }
 0x560   :  { %v1272_v50 = vadd.f32 1.0, %v3008_v25  ;;  %v3010_v27 = vpop.eup %3009 }
 0x561   :  { %v1273_v30 = vadd.f32 1.0, %v3010_v27 }
 0x562   :  { %3011 = vrcp.f32 %v1272_v50 }
 0x563   :  { %3013 = vrcp.f32 %v1273_v30 }
 0x56c   :  { %v3012_v35 = vpop.eup %3011 }
 0x56d   :  { %v1279_v36 = vmul.f32 %v3012_v35, %v1278_v32  ;;  %v3014_v38 = vpop.eup %3013  ;;  %v1800_v32 = vld [vmem:[#allocation10 + $0x18] sm:$0xff] }
 0x56e   :  { %v1282_v43 = vsub.f32 1.0, %v3014_v38  ;;  %v1284_v49 = vmul.f32 %v3014_v38, %v1116_v6 }
 0x56f   :  { %v1280_v37 = vadd.f32 %v1279_v36, %v3443_v60  ;;  %v1801_v36 = vld [vmem:[#allocation10 + $0x20] sm:$0xff] }
 0x571   :  { %3015 = vtanh.f32 %v1280_v37  ;;  %v1802_v37 = vld [vmem:[#allocation10 + $0x28] sm:$0xff] }
 0x572   :  { %v2906_v38 = vpack.c.bf16 %v1802_v37, %v1801_v36 }
 0x57b   :  { %v3016_v41 = vpop.eup %3015 }
 0x57c   :  { %v1283_v46 = vmul.f32 %v3016_v41, %v1282_v43  ;;  %v1803_v43 = vld [vmem:[#allocation10 + $0x30] sm:$0xff] }
 0x57e   :  { %v1285_v52 = vadd.f32 %v1284_v49, %v1283_v46  ;;  %v1805_v46 = vld [vmem:[#allocation10 + $0x40] sm:$0xff]  ;;  %v1806_v49 = vld [vmem:[#allocation10 + $0x48] sm:$0xff] }
 0x580   :  { %1351 = vmatmul.mubr.f32.vlgmr.msra.gmra.mrb[10].mxu0 %v1285_v52  ;;  %2336 = vmatmul.mubr.f32.vlgmr.msra.gmra.mrb[18].mxu1 %v1285_v52 }
 0x581   :  { %2790 = vmatpush1.bf16.msra.mxu0 %v3288_v15  ;;  %2821 = vmatpush3.bf16.msra.mxu1 %v3310_v40 }
 0x582   :  { %2792 = vmatprep.subr.bf16.mxu0 %v3291_v16  ;;  %2822 = vmatprep.subr.bf16.mxu1 %v3174_v48 }
 0x583   :  { %1519 = vmatprep.mubr.f32.mxu0 %v3173_v0  ;;  %2370 = vmatprep.mubr.msk.f32.mxu1 %vm3175_vm1, %v3173_v0 }
 0x585   :  { %2794 = vmatpush1.bf16.msra.mxu0 %v3296_v22  ;;  %2824 = vmatpush3.bf16.msra.mxu1 %v3323_v51 }
 0x586   :  { %2796 = vmatprep.subr.bf16.mxu0 %v3299_v23  ;;  %2825 = vmatprep.subr.bf16.mxu1 %v3174_v48 }
 0x589   :  { %2798 = vmatpush1.bf16.msra.mxu0 %v3304_v31  ;;  %2827 = vmatpush3.bf16.msra.mxu1 %v3336_v61 }
 0x58a   :  { %2800 = vmatprep.subr.bf16.mxu0 %v3307_v33  ;;  %2828 = vmatprep.subr.bf16.mxu1 %v3174_v48 }
 0x58d   :  { %2802 = vmatpush1.bf16.msra.mxu0 %v3314_v42  ;;  %2830 = vmatpush3.bf16.msra.mxu1 %v3349_v8 }
 0x58e   :  { %2804 = vmatprep.subr.bf16.mxu0 %v3317_v45  ;;  %2831 = vmatprep.subr.bf16.mxu1 %v3174_v48 }
 0x591   :  { %2806 = vmatpush1.bf16.msra.mxu0 %v3327_v53  ;;  %2833 = vmatpush3.bf16.msra.mxu1 %v3362_v19 }
 0x592   :  { %2808 = vmatprep.subr.bf16.mxu0 %v3330_v56  ;;  %2834 = vmatprep.subr.bf16.mxu1 %v3174_v48 }
 0x595   :  { %2810 = vmatpush1.bf16.msra.mxu0 %v3340_v63  ;;  %2836 = vmatpush3.bf16.msra.mxu1 %v3373_v26 }
 0x596   :  { %2812 = vmatprep.subr.bf16.mxu0 %v3343_v3  ;;  %2837 = vmatprep.subr.bf16.mxu1 %v3174_v48 }
 0x599   :  { %2814 = vmatpush1.bf16.msra.mxu0 %v3353_v10  ;;  %2839 = vmatpush3.bf16.msra.mxu1 %v3383_v29 }
 0x59a   :  { %2816 = vmatprep.subr.bf16.mxu0 %v3356_v14  ;;  %2840 = vmatprep.subr.bf16.mxu1 %v3174_v48 }
 0x59d   :  { %2818 = vmatpush1.bf16.msra.mxu0 %v3366_v21  ;;  %2842 = vmatpush3.bf16.msra.mxu1 %v3392_v34 }
 0x59e   :  { %2844 = vmatprep.subr.bf16.mxu0 %v3286_v12  ;;  %2875 = vmatprep.subr.bf16.mxu1 %v3174_v48 }
 0x653   :  { %v1352_v60 = vpop.f32.mrb[10].mxu0  ;;  %v1423_v54 = vpop.f32.mrb[18].mxu1 }
 0x654   :  { %v2933_v55 = vadd.f32 %v1352_v60, %v3441_v59  ;;  %v1354_v39 = vpop.f32.mrb[11].mxu0  ;;  %v2337_v44 = vpop.f32.mrb[19].mxu1  ;;  %v1447_v12 = vadd.f32 %v3456_v28, %v1423_v54  ;;  %v1807_v60 = vld [vmem:[#allocation10 + $0x50] sm:$0xff]  ;;  %v1808_v54 = vld [vmem:[#allocation10 + $0x58] sm:$0xff] }
 0x655   :  { %v2934_v62 = vadd.f32 %v1354_v39, %v3445_v2  ;;  %v1809_v39 = vld [vmem:[#allocation10 + $0x60] sm:$0xff]  ;;  %v1810_v44 = vld [vmem:[#allocation10 + $0x68] sm:$0xff] }
 0x656   :  { %v1942_v58 = vmul.f32 -1.442695, %v2933_v55  ;;  %v2915_v55 = vpack.c.bf16 %v1808_v54, %v1807_v60 }
 0x657   :  { %v1943_v1 = vmul.f32 -1.442695, %v2934_v62  ;;  %v1811_v62 = vld [vmem:[#allocation10 + $0x70] sm:$0xff] }
 0x658   :  { %3017 = vpow2.f32 %v1942_v58  ;;  %v2918_v58 = vpack.c.bf16 %v1810_v44, %v1809_v39 }
 0x659   :  { %3019 = vpow2.f32 %v1943_v1  ;;  %v1812_v1 = vld [vmem:[#allocation10 + $0x78] sm:$0xff] }
 0x662   :  { %v3018_v5 = vpop.eup %3017 }
 0x663   :  { %v1441_v6 = vadd.f32 1.0, %v3018_v5  ;;  %v3020_v47 = vpop.eup %3019  ;;  %v2921_v5 = vpack.c.bf16 %v1812_v1, %v1811_v62 }
 0x664   :  { %v1442_v7 = vadd.f32 1.0, %v3020_v47 }
 0x665   :  { %3021 = vrcp.f32 %v1441_v6 }
 0x666   :  { %3023 = vrcp.f32 %v1442_v7 }
 0x66f   :  { %v3022_v11 = vpop.eup %3021 }
 0x670   :  { %v1448_v13 = vmul.f32 %v3022_v11, %v1447_v12  ;;  %v3024_v18 = vpop.eup %3023 }
 0x671   :  { %v1451_v20 = vsub.f32 1.0, %v3024_v18  ;;  %v1453_v50 = vmul.f32 %v3024_v18, %v1285_v52  ;;  %v2912_v52 = vpack.c.bf16 %v1806_v49, %v1805_v46 }
 0x672   :  { %v1449_v17 = vadd.f32 %v1448_v13, %v3439_v57  ;;  %v1798_v57 = vld [vmem:[#allocation10 + $0x8] sm:$0xff] }
 0x674   :  { %3025 = vtanh.f32 %v1449_v17 }
 0x67e   :  { %v3026_v24 = vpop.eup %3025 }
 0x67f   :  { %v1452_v25 = vmul.f32 %v3026_v24, %v1451_v20 }
 0x681   :  { %v1454_v27 = vadd.f32 %v1453_v50, %v1452_v25 }
 0x683   :  { %1520 = vmatmul.mubr.f32.vlgmr.msra.gmra.mrb[12].mxu0 %v1454_v27  ;;  %2371 = vmatmul.mubr.f32.vlgmr.msra.gmra.mrb[20].mxu1 %v1454_v27 }
 0x684   :  { %2846 = vmatpush1.bf16.msra.mxu0 %v3288_v15  ;;  %2877 = vmatpush3.bf16.msra.mxu1 %v3310_v40 }
 0x685   :  { %2848 = vmatprep.subr.bf16.mxu0 %v3291_v16  ;;  %2878 = vmatprep.subr.bf16.mxu1 %v3174_v48 }
 0x686   :  { %1688 = vmatprep.mubr.f32.mxu0 %v3173_v0  ;;  %2405 = vmatprep.mubr.msk.f32.mxu1 %vm3175_vm1, %v3173_v0 }
 0x688   :  { %2850 = vmatpush1.bf16.msra.mxu0 %v3296_v22  ;;  %2880 = vmatpush3.bf16.msra.mxu1 %v3323_v51 }
 0x689   :  { %2852 = vmatprep.subr.bf16.mxu0 %v3299_v23  ;;  %2881 = vmatprep.subr.bf16.mxu1 %v3174_v48 }
 0x68c   :  { %2854 = vmatpush1.bf16.msra.mxu0 %v3304_v31  ;;  %2883 = vmatpush3.bf16.msra.mxu1 %v3336_v61 }
 0x68d   :  { %2856 = vmatprep.subr.bf16.mxu0 %v3307_v33  ;;  %2884 = vmatprep.subr.bf16.mxu1 %v3174_v48 }
 0x690   :  { %2858 = vmatpush1.bf16.msra.mxu0 %v3314_v42  ;;  %2886 = vmatpush3.bf16.msra.mxu1 %v3349_v8 }
 0x691   :  { %2860 = vmatprep.subr.bf16.mxu0 %v3317_v45  ;;  %2887 = vmatprep.subr.bf16.mxu1 %v3174_v48 }
 0x694   :  { %2862 = vmatpush1.bf16.msra.mxu0 %v3327_v53  ;;  %2889 = vmatpush3.bf16.msra.mxu1 %v3362_v19 }
 0x695   :  { %2864 = vmatprep.subr.bf16.mxu0 %v3330_v56  ;;  %2890 = vmatprep.subr.bf16.mxu1 %v3174_v48 }
 0x698   :  { %2866 = vmatpush1.bf16.msra.mxu0 %v3340_v63  ;;  %2892 = vmatpush3.bf16.msra.mxu1 %v3373_v26 }
 0x699   :  { %2868 = vmatprep.subr.bf16.mxu0 %v3343_v3  ;;  %2893 = vmatprep.subr.bf16.mxu1 %v3174_v48 }
 0x69c   :  { %2870 = vmatpush1.bf16.msra.mxu0 %v3353_v10  ;;  %2895 = vmatpush3.bf16.msra.mxu1 %v3383_v29 }
 0x69d   :  { %2872 = vmatprep.subr.bf16.mxu0 %v3356_v14  ;;  %2896 = vmatprep.subr.bf16.mxu1 %v3174_v48 }
 0x6a0   :  { %2874 = vmatpush1.bf16.msra.mxu0 %v3366_v21  ;;  %2898 = vmatpush3.bf16.msra.mxu1 %v3392_v34  ;;  %v1797_v34 = vld [vmem:[#allocation10] sm:$0xff] }
 0x6a1   :  { %2899 = vmatprep.subr.bf16.mxu0 %v3174_v48  ;;  %v2900_v30 = vpack.c.bf16 %v1798_v57, %v1797_v34 }
 0x756   :  { %v1521_v15 = vpop.f32.mrb[12].mxu0  ;;  %v1592_v16 = vpop.f32.mrb[20].mxu1 }
 0x757   :  { %v2935_v22 = vadd.f32 %v1521_v15, %v3441_v59  ;;  %v1523_v23 = vpop.f32.mrb[13].mxu0  ;;  %v2372_v31 = vpop.f32.mrb[21].mxu1  ;;  %v1616_v61 = vadd.f32 %v3456_v28, %v1592_v16 }
 0x758   :  { %v2936_v40 = vadd.f32 %v1523_v23, %v3445_v2 }
 0x759   :  { %v1944_v33 = vmul.f32 -1.442695, %v2935_v22 }
 0x75a   :  { %v1945_v42 = vmul.f32 -1.442695, %v2936_v40  ;;  %v1948_v40 = vld [vmem:[%s3731_s6] ss:$0 sm:$0xff] }
 0x75b   :  { %3027 = vpow2.f32 %v1944_v33 }
 0x75c   :  { %3029 = vpow2.f32 %v1945_v42 }
 0x765   :  { %v3028_v45 = vpop.eup %3027 }
 0x766   :  { %v1610_v51 = vadd.f32 1.0, %v3028_v45  ;;  %v3030_v53 = vpop.eup %3029 }
 0x767   :  { %v1611_v56 = vadd.f32 1.0, %v3030_v53 }
 0x768   :  { %3031 = vrcp.f32 %v1610_v51 }
 0x769   :  { %3033 = vrcp.f32 %v1611_v56 }
 0x772   :  { %v3032_v63 = vpop.eup %3031 }
 0x773   :  { %v1617_v3 = vmul.f32 %v3032_v63, %v1616_v61  ;;  %v3034_v10 = vpop.eup %3033 }
 0x774   :  { %v1620_v14 = vsub.f32 1.0, %v3034_v10  ;;  %v1622_v26 = vmul.f32 %v3034_v10, %v1454_v27 }
 0x775   :  { %v1618_v8 = vadd.f32 %v1617_v3, %v3450_v9  ;;  %v1799_v9 = vld [vmem:[#allocation10 + $0x10] sm:$0xff] }
 0x776   :  { %v2903_v35 = vpack.c.bf16 %v1800_v32, %v1799_v9 }
 0x777   :  { %3035 = vtanh.f32 %v1618_v8 }
 0x781   :  { %v3036_v19 = vpop.eup %3035 }
 0x782   :  { %v1621_v21 = vmul.f32 %v3036_v19, %v1620_v14 }
 0x784   :  { %v3692_v29 = vadd.f32 %v1622_v26, %v1621_v21 }
 0x786   :  { %1689 = vmatmul.mubr.f32.vlgmr.msra.gmra.mrb[14].mxu0 %v3692_v29  ;;  %2406 = vmatmul.mubr.f32.vlgmr.msra.gmra.mrb[22].mxu1 %v3692_v29 }
 0x787   :  { %2440 = vmatprep.mubr.msk.f32.mxu0 %vm3175_vm1, %v3173_v0  ;;  %2901 = vmatpush3.bf16.msra.mxu0 %v2900_v30  ;;  %v1804_v0 = vld [vmem:[#allocation10 + $0x38] sm:$0xff] }
 0x788   :  { %2902 = vmatprep.subr.bf16.mxu0 %v3174_v48  ;;  %v2909_v41 = vpack.c.bf16 %v1804_v0, %v1803_v43 }
 0x78b   :  { %2904 = vmatpush3.bf16.msra.mxu0 %v2903_v35 }
 0x78c   :  { %2905 = vmatprep.subr.bf16.mxu0 %v3174_v48 }
 0x78f   :  { %2907 = vmatpush3.bf16.msra.mxu0 %v2906_v38 }
 0x790   :  { %2908 = vmatprep.subr.bf16.mxu0 %v3174_v48 }
 0x793   :  { %2910 = vmatpush3.bf16.msra.mxu0 %v2909_v41 }
 0x794   :  { %2911 = vmatprep.subr.bf16.mxu0 %v3174_v48 }
 0x797   :  { %2913 = vmatpush3.bf16.msra.mxu0 %v2912_v52 }
 0x798   :  { %2914 = vmatprep.subr.bf16.mxu0 %v3174_v48 }
 0x79b   :  { %2916 = vmatpush3.bf16.msra.mxu0 %v2915_v55 }
 0x79c   :  { %2917 = vmatprep.subr.bf16.mxu0 %v3174_v48 }
 0x79f   :  { %2919 = vmatpush3.bf16.msra.mxu0 %v2918_v58 }
 0x7a0   :  { %2920 = vmatprep.subr.bf16.mxu0 %v3174_v48 }
 0x7a3   :  { %2922 = vmatpush3.bf16.msra.mxu0 %v2921_v5 }
 0x859   :  { %v1690_v6 = vpop.f32.mrb[14].mxu0  ;;  %v1761_v47 = vpop.f32.mrb[22].mxu1 }
 0x85a   :  { %v2937_v7 = vadd.f32 %v1690_v6, %v3441_v59  ;;  %v1692_v12 = vpop.f32.mrb[15].mxu0  ;;  %v2407_v11 = vpop.f32.mrb[23].mxu1  ;;  %v1785_v48 = vadd.f32 %v3456_v28, %v1761_v47 }
 0x85b   :  { %v2938_v17 = vadd.f32 %v1692_v12, %v3445_v2 }
 0x85c   :  { %v1946_v13 = vmul.f32 -1.442695, %v2937_v7 }
 0x85d   :  { %v1947_v18 = vmul.f32 -1.442695, %v2938_v17 }
 0x85e   :  { %3037 = vpow2.f32 %v1946_v13 }
 0x85f   :  { %3039 = vpow2.f32 %v1947_v18 }
 0x868   :  { %v3038_v20 = vpop.eup %3037 }
 0x869   :  { %v1779_v24 = vadd.f32 1.0, %v3038_v20  ;;  %v3040_v25 = vpop.eup %3039 }
 0x86a   :  { %v1780_v50 = vadd.f32 1.0, %v3040_v25 }
 0x86b   :  { %3041 = vrcp.f32 %v1779_v24 }
 0x86c   :  { %3043 = vrcp.f32 %v1780_v50 }
 0x875   :  { %v3042_v27 = vpop.eup %3041 }
 0x876   :  { %v1786_v15 = vmul.f32 %v3042_v27, %v1785_v48  ;;  %v3044_v16 = vpop.eup %3043 }
 0x877   :  { %v1789_v22 = vsub.f32 1.0, %v3044_v16  ;;  %v1791_v31 = vmul.f32 %v3044_v16, %v3692_v29 }
 0x878   :  { %v1787_v59 = vadd.f32 %v1786_v15, %v3447_v4 }
 0x87a   :  { %3045 = vtanh.f32 %v1787_v59 }
 0x884   :  { %v3046_v23 = vpop.eup %3045 }
 0x885   :  { %v1790_v2 = vmul.f32 %v3046_v23, %v1789_v22 }
 0x887   :  { %v1792_v33 = vadd.f32 %v1791_v31, %v1790_v2 }
 0x889   :  { %2441 = vmatmul.mubr.f32.vlgmr.msra.gmra.mrb[16].mxu0 %v1792_v33 }
 0x95c   :  { %v1886_v28 = vpop.f32.mrb[16].mxu0 }
 0x95d   :  { %v1887_v42 = vadd.f32 %v1948_v40, %v1886_v28  ;;  %v2442_v45 = vpop.f32.mrb[17].mxu0 }
 0x95f   :  { %1890 = vst [vmem:[#allocation12] sm:$0xff] %v1887_v42 }
 0x960   :  { %3146 = shalt.err (!%p3143_p8)
}
 0x961   :  { %s3147_s13 = scalar_lea.hbm %s3732_s7, 128 }
 0x962   :  { %p3148_p9 = scmp.ne.s32.totalorder %s3732_s7, %s3147_s13  ;;  %p3151_p10 = scmp.lt.u32.totalorder %s3147_s13, %s3732_s7 }
 0x964   :  { %p3153_p11 = pnand %p3151_p10, %p3148_p9 }
 0x966   :  { %3156 = shalt.err (!%p3153_p11)
}
 0x967   :  { %1900 = dma.vmem_to_hbm [thread:$0]  %s1898_s30, 128, %s3732_s7, [#allocation6]  }
 0x968   :  { %3163 = dma.done.wait [#allocation6], 128  }
 0x969   :  { %3164 = vsyncadd [#allocation6], 4294967168 }
 0x96a   :  { %1904 = vsyncpa [#allocation5], 1 }
 0x96b   :  { %1905 = vsyncpa [#allocation8], 1 }
 0x96c   :  { %1906 = vsyncpa [#allocation11], 1 }
 0x96d   :  { %1907 = vsyncpa [#allocation6], 1 }

</bundles_post_ra>
